<compile_context>
chip_gen: v6e
topology: v6e:2x2x1
jax: 0.10.0
libtpu: 0.0.40
codegen_flags: <defaults>
</compile_context>

<pallas_src>
import functools

import jax
import jax.numpy as jnp
from jax import lax
from jax.experimental import pallas as pl
from jax.experimental.pallas import tpu as pltpu  # noqa: F401  (TPU backend)

# ---------------- config (small, consistent with SimplePose3D cfg) ----------------
BATCH = 2
IMG_C, IMG_H, IMG_W = 3, 64, 64
PATCH = 16                      # backbone stand-in patchify stride
FEAT_CH = 64                    # stand-in feature_channel
DECONV_DIM = [32, 32]           # cfg['NUM_DECONV_FILTERS']
NUM_JOINTS = 6                  # PRESET.NUM_JOINTS
DEPTH_DIM = 8                   # cfg['DEPTH_DIM']
HEIGHT_DIM = 16                 # PRESET.HEATMAP_SIZE[0]
WIDTH_DIM = 16                  # PRESET.HEATMAP_SIZE[1]
BN_EPS = 1e-5

# packed pose-head output slab layout (lane-dense, 128 wide)
_LANE = 128
_OFF_X = 0                                   # hm_x : [0, W)
_OFF_Y = _OFF_X + WIDTH_DIM                  # hm_y : [16, 16+H)
_OFF_Z = _OFF_Y + HEIGHT_DIM                 # hm_z : [32, 32+D)
_OFF_P = _OFF_Z + DEPTH_DIM                  # pred : [40, 43)  (cx, cy, cz)
_OFF_MV = _OFF_P + 3                         # maxv : [43, 44)
assert _OFF_MV + 1 <= _LANE


# ---------------- Pallas kernel 1: stem matmul + bias + fused ReLU -----------------
def _matmul_bias_relu_kernel(a_ref, b_ref, bias_ref, o_ref):
    # a / b arrive pre-cast to bf16; f32 accumulation on the MXU.
    acc = jnp.dot(a_ref[...], b_ref[...], preferred_element_type=jnp.float32)
    o_ref[...] = jnp.maximum(acc + bias_ref[...], 0.0)


def pallas_matmul_bias_relu(a, b, bias):
    # Tiny matmul (M=32, K=768, N=64): single grid-less invocation, whole arrays
    # resident in VMEM — no pipeline scaffolding.
    M, _ = a.shape
    N = b.shape[1]
    return pl.pallas_call(
        _matmul_bias_relu_kernel,
        out_shape=jax.ShapeDtypeStruct((M, N), jnp.float32),
    )(a, b, bias.reshape(1, N))


# -------- Pallas kernel 2: fused final 1x1 conv + softmax pose head (whole batch) ---
def _final_pose_head_kernel(feat_ref, w_ref, b_ref, proj_ref, out_ref,
                            *, B, J, D, H, W):
    HW = H * W

    # One fused MXU matmul covering the whole batch:
    #   (J*D, Cd) x (Cd, B*HW) = (48, 32) x (32, 512) -> (48, 512), f32 accumulation.
    # feat blocks are 256-lane aligned, so the concat is a free vreg placement.
    feat = jnp.concatenate([feat_ref[b] for b in range(B)], axis=-1)     # bf16
    logits = jnp.dot(w_ref[...], feat, preferred_element_type=jnp.float32)
    logits = logits + b_ref[...]                                         # (J*D, 1) bias

    proj = proj_ref[...]                                                 # (HW, W+H+2) bf16

    for b in range(B):                    # B=2, statically unrolled; 256-aligned slices
        h = logits[:, b * HW:(b + 1) * HW].reshape(J, D, HW)             # (6, 8, 256)

        # norm_heatmap('softmax') over flattened (D, H, W) per joint
        m = jnp.max(jnp.max(h, axis=2, keepdims=True), axis=1, keepdims=True)
        p = jnp.exp(h - m)
        s = jnp.sum(jnp.sum(p, axis=2, keepdims=True), axis=1, keepdims=True)
        p = p * pl.reciprocal(s, approx=True)                            # EUP, not VPU div

        # maxvals = max over spatial of the normalized heatmap
        mv = jnp.max(jnp.max(p, axis=2), axis=1, keepdims=True)          # (J, 1)

        # NOTE: torch's `heatmaps = out / out.sum(dim=2)` is an exact no-op after
        # softmax (sum == 1 up to f32 rounding), so it is skipped.

        # marginals + soft-argmax numerators via ONE small bf16 MXU matmul:
        # proj columns = [x indicators (W) | y indicators (H) | hw%W | hw//W]
        hm_z = jnp.sum(p, axis=2)                                        # (J, D)
        sd = jnp.sum(p, axis=1).astype(jnp.bfloat16)                     # (J, HW)
        marg = jnp.dot(sd, proj, preferred_element_type=jnp.float32)     # (J, W+H+2)

        hm_xy = marg[:, :W + H]                                          # hm_x | hm_y
        cx = marg[:, W + H:W + H + 1] * (1.0 / W) - 0.5
        cy = marg[:, W + H + 1:W + H + 2] * (1.0 / H) - 0.5
        wz = lax.broadcasted_iota(jnp.int32, (J, D), 1).astype(jnp.float32)
        cz = jnp.sum(hm_z * wz, axis=1, keepdims=True) * (1.0 / D) - 0.5

        # assemble the lane-dense (J, 128) slab in vregs -> ONE full-width store
        pad = jnp.zeros((J, _LANE - (W + H + D + 4)), jnp.float32)
        out_ref[b] = jnp.concatenate([hm_xy, hm_z, cx, cy, cz, mv, pad], axis=-1)


def pallas_final_pose_head(feats, w, bias, *, num_joints, depth_dim,
                           height_dim, width_dim):
    B, Cd, HW = feats.shape
    J, D, H, W = num_joints, depth_dim, height_dim, width_dim
    assert HW == H * W and w.shape == (J * D, Cd)

    # merged projection matrix (constant, bf16, constant-folded by XLA):
    #   columns [0,W): x indicators, [W,W+H): y indicators, then hw%W and hw//W
    hw_idx = jnp.arange(HW, dtype=jnp.int32)
    px = (hw_idx[:, None] % W ==
          jnp.arange(W, dtype=jnp.int32)[None, :]).astype(jnp.float32)   # (HW, W)
    py = (hw_idx[:, None] // W ==
          jnp.arange(H, dtype=jnp.int32)[None, :]).astype(jnp.float32)   # (HW, H)
    wx = (hw_idx % W).astype(jnp.float32)[:, None]                       # (HW, 1)
    wy = (hw_idx // W).astype(jnp.float32)[:, None]                      # (HW, 1)
    proj = jnp.concatenate([px, py, wx, wy], axis=1).astype(jnp.bfloat16)

    kern = functools.partial(_final_pose_head_kernel, B=B, J=J, D=D, H=H, W=W)
    slab = pl.pallas_call(
        kern,
        out_shape=jax.ShapeDtypeStruct((B, J, _LANE), jnp.float32),
    )(feats, w, bias.reshape(J * D, 1), proj)

    pred_jts = slab[:, :, _OFF_P:_OFF_P + 3]
    maxvals = slab[:, :, _OFF_MV:_OFF_MV + 1]
    hm_x = slab[:, :, _OFF_X:_OFF_X + W]
    hm_y = slab[:, :, _OFF_Y:_OFF_Y + H]
    hm_z = slab[:, :, _OFF_Z:_OFF_Z + D]
    return pred_jts, maxvals, hm_x, hm_y, hm_z


# ---------------- JAX glue: deconv (PyTorch ConvTranspose2d semantics) -------------
# TODO(synk): the two ConvTranspose2d(k=4,s=2,p=1)+BN+ReLU stages could be expressed
# as 4 sub-pixel matmuls each and fused with the stem + pose head into a single
# pallas_call (activations <0.2 MiB, fits VMEM on every generation); kept in XLA
# here for exactness of the transposed-conv boundary handling.
def conv_transpose2d(x, w, stride=2, padding=1):
    # x: (B, Cin, H, W); w: (Cin, Cout, kH, kW) -- exact nn.ConvTranspose2d semantics
    k = w.shape[2]
    w_flip = jnp.flip(w, axis=(2, 3))
    w_oihw = jnp.transpose(w_flip, (1, 0, 2, 3))
    pad = k - 1 - padding
    return lax.conv_general_dilated(
        x, w_oihw, window_strides=(1, 1),
        padding=((pad, pad), (pad, pad)),
        lhs_dilation=(stride, stride),
        dimension_numbers=('NCHW', 'OIHW', 'NCHW'))


# ---------------- deterministic parameter init -------------------------------------
def init_params(key):
    ks = jax.random.split(key, 8)
    params = {}
    # constant MXU operands stored pre-cast to bf16 (halves DMA, no in-kernel casts)
    params['stem_w'] = (jax.random.normal(
        ks[0], (IMG_C * PATCH * PATCH, FEAT_CH), jnp.float32) * 0.02
    ).astype(jnp.bfloat16)
    params['stem_b'] = jnp.zeros((FEAT_CH,), jnp.float32)
    in_ch = FEAT_CH
    deconvs = []
    for i, out_ch in enumerate(DECONV_DIM):
        w = jax.random.normal(ks[1 + i], (in_ch, out_ch, 4, 4), jnp.float32) * 0.001
        bn = dict(gamma=jnp.ones((out_ch,), jnp.float32),
                  beta=jnp.zeros((out_ch,), jnp.float32),
                  mean=jnp.zeros((out_ch,), jnp.float32),
                  var=jnp.ones((out_ch,), jnp.float32))
        deconvs.append(dict(w=w, bn=bn))
        in_ch = out_ch
    params['deconvs'] = deconvs
    # final 1x1 conv weight stored as (Cout, Cin) = (J*D, Cd), PyTorch conv layout
    params['final_w'] = (jax.random.normal(
        ks[5], (NUM_JOINTS * DEPTH_DIM, in_ch), jnp.float32) * 0.001
    ).astype(jnp.bfloat16)
    params['final_b'] = jnp.zeros((NUM_JOINTS * DEPTH_DIM,), jnp.float32)
    return params


# ---------------- forward ------------------------------------------------------------
def simplepose3d_forward(params, x):
    B = x.shape[0]

    # TODO(synk): pretrained torchvision ResNet backbone (self.preact) has no clean
    # in-script equivalent; replaced by a deterministic 16x16-patchify linear
    # projection + fused ReLU, executed on the Pallas matmul kernel.
    Hp, Wp = IMG_H // PATCH, IMG_W // PATCH
    patches = x.reshape(B, IMG_C, Hp, PATCH, Wp, PATCH)
    patches = jnp.transpose(patches, (0, 2, 4, 1, 3, 5)).reshape(
        B * Hp * Wp, IMG_C * PATCH * PATCH).astype(jnp.bfloat16)
    feat = pallas_matmul_bias_relu(patches, params['stem_w'], params['stem_b'])
    feat = feat.reshape(B, Hp, Wp, FEAT_CH).transpose(0, 3, 1, 2)      # NCHW

    # deconv_layers: ConvTranspose2d(k=4,s=2,p=1,no bias) with BN(eval) folded into
    # the weights + fused ReLU  (BN-eval is a per-channel affine => exact fold).
    out = feat
    for layer in params['deconvs']:
        bn = layer['bn']
        inv = bn['gamma'] / jnp.sqrt(bn['var'] + BN_EPS)
        w_fold = layer['w'] * inv[None, :, None, None]                 # scale Cout
        b_fold = (bn['beta'] - bn['mean'] * inv)[None, :, None, None]
        out = conv_transpose2d(out, w_fold, stride=2, padding=1)
        out = jax.nn.relu(out + b_fold)

    # final 1x1 conv + softmax head fused in one grid-less Pallas kernel.
    # Features go in channel-major (B, Cd, H*W): a pure reshape of NCHW; the bf16
    # cast fuses into the preceding ReLU fusion and halves the input DMA.
    B_, Cd, Hh, Ww = out.shape
    feats = out.reshape(B_, Cd, Hh * Ww).astype(jnp.bfloat16)

    pred_jts, maxvals, hm_x, hm_y, hm_z = pallas_final_pose_head(
        feats, params['final_w'], params['final_b'],
        num_joints=NUM_JOINTS, depth_dim=DEPTH_DIM,
        height_dim=HEIGHT_DIM, width_dim=WIDTH_DIM)

    return dict(pred_jts=pred_jts, maxvals=maxvals,
                hm_x=hm_x, hm_y=hm_y, hm_z=hm_z)


if __name__ == "__main__":
    key = jax.random.PRNGKey(0)
    kx, kp = jax.random.split(key)
    x = jax.random.normal(kx, (BATCH, IMG_C, IMG_H, IMG_W), jnp.float32)
    params = init_params(kp)

    out = jax.jit(simplepose3d_forward)(params, x)
    jax.block_until_ready(out)

    assert out['pred_jts'].shape == (BATCH, NUM_JOINTS, 3)
    assert out['maxvals'].shape == (BATCH, NUM_JOINTS, 1)
    assert out['hm_x'].shape == (BATCH, NUM_JOINTS, WIDTH_DIM)
    assert out['hm_y'].shape == (BATCH, NUM_JOINTS, HEIGHT_DIM)
    assert out['hm_z'].shape == (BATCH, NUM_JOINTS, DEPTH_DIM)
    assert bool(jnp.all(jnp.isfinite(out['pred_jts'])))
    print("KERNEL_OK")
</pallas_src>

<mosaic_0001>
module attributes {stable_mosaic.version = 11 : i64} {
  func.func @_matmul_bias_relu_kernel(%arg0: memref<32x768xbf16, #tpu.memory_space<vmem>>, %arg1: memref<768x64xbf16, #tpu.memory_space<vmem>>, %arg2: memref<1x64xf32, #tpu.memory_space<vmem>>, %arg3: memref<32x64xf32, #tpu.memory_space<vmem>>) attributes {dimension_semantics = [], scalar_prefetch = 0 : i64, scratch_operands = 0 : i64, tpu.core_type = #tpu.core_type<tc>} {
    %c0 = arith.constant 0 : index
    %c0_0 = arith.constant 0 : index
    %0 = vector.load %arg0[%c0, %c0_0] : memref<32x768xbf16, #tpu.memory_space<vmem>>, vector<32x768xbf16>
    %c0_1 = arith.constant 0 : index
    %c0_2 = arith.constant 0 : index
    %1 = vector.load %arg1[%c0_1, %c0_2] : memref<768x64xbf16, #tpu.memory_space<vmem>>, vector<768x64xbf16>
    %cst = arith.constant dense<0.000000e+00> : vector<32x64xf32>
    %2 = tpu.matmul %0, %1, %cst {dimension_numbers = #tpu.dot_dimension_numbers<[1], [0], [0], [1], [0, 0, 1, 1], [], []>} : vector<32x768xbf16>, vector<768x64xbf16>, vector<32x64xf32> -> vector<32x64xf32>
    %c0_3 = arith.constant 0 : index
    %c0_4 = arith.constant 0 : index
    %3 = vector.load %arg2[%c0_3, %c0_4] : memref<1x64xf32, #tpu.memory_space<vmem>>, vector<1x64xf32>
    %4 = vector.broadcast %3 : vector<1x64xf32> to vector<32x64xf32>
    %5 = arith.addf %2, %4 : vector<32x64xf32>
    %cst_5 = arith.constant 0.000000e+00 : f32
    %6 = vector.broadcast %cst_5 : f32 to vector<32x64xf32>
    %7 = arith.maximumf %5, %6 : vector<32x64xf32>
    %c0_6 = arith.constant 0 : index
    %c0_7 = arith.constant 0 : index
    %8 = vector.load %arg3[%c0_6, %c0_7] : memref<32x64xf32, #tpu.memory_space<vmem>>, vector<32x64xf32>
    tpu.vector_store %arg3[%c0_6, %c0_7], %7 {strides = array<i32>} : memref<32x64xf32, #tpu.memory_space<vmem>>, vector<32x64xf32>,
    return
  }
}

module attributes {stable_mosaic.version = 11 : i64} {
  func.func @_final_pose_head_kernel(%arg0: memref<2x32x256xbf16, #tpu.memory_space<vmem>>, %arg1: memref<48x32xbf16, #tpu.memory_space<vmem>>, %arg2: memref<48x1xf32, #tpu.memory_space<vmem>>, %arg3: memref<256x34xbf16, #tpu.memory_space<vmem>>, %arg4: memref<2x6x128xf32, #tpu.memory_space<vmem>>) attributes {dimension_semantics = [], scalar_prefetch = 0 : i64, scratch_operands = 0 : i64, tpu.core_type = #tpu.core_type<tc>} {
    %c0 = arith.constant 0 : index
    %c0_0 = arith.constant 0 : index
    %c0_1 = arith.constant 0 : index
    %0 = vector.load %arg0[%c0, %c0_0, %c0_1] : memref<2x32x256xbf16, #tpu.memory_space<vmem>>, vector<1x32x256xbf16>
    %1 = vector.shape_cast %0 : vector<1x32x256xbf16> to vector<32x256xbf16>
    %c1 = arith.constant 1 : index
    %c0_2 = arith.constant 0 : index
    %c0_3 = arith.constant 0 : index
    %2 = vector.load %arg0[%c1, %c0_2, %c0_3] : memref<2x32x256xbf16, #tpu.memory_space<vmem>>, vector<1x32x256xbf16>
    %3 = vector.shape_cast %2 : vector<1x32x256xbf16> to vector<32x256xbf16>
    %4 = tpu.concatenate %1, %3 in 1 : vector<32x256xbf16>, vector<32x256xbf16> -> vector<32x512xbf16>
    %c0_4 = arith.constant 0 : index
    %c0_5 = arith.constant 0 : index
    %5 = vector.load %arg1[%c0_4, %c0_5] : memref<48x32xbf16, #tpu.memory_space<vmem>>, vector<48x32xbf16>
    %cst = arith.constant dense<0.000000e+00> : vector<48x512xf32>
    %6 = tpu.matmul %5, %4, %cst {dimension_numbers = #tpu.dot_dimension_numbers<[1], [0], [0], [1], [0, 0, 1, 1], [], []>} : vector<48x32xbf16>, vector<32x512xbf16>, vector<48x512xf32> -> vector<48x512xf32>
    %c0_6 = arith.constant 0 : index
    %c0_7 = arith.constant 0 : index
    %7 = vector.load %arg2[%c0_6, %c0_7] : memref<48x1xf32, #tpu.memory_space<vmem>>, vector<48x1xf32>
    %8 = vector.broadcast %7 : vector<48x1xf32> to vector<48x512xf32>
    %9 = arith.addf %6, %8 : vector<48x512xf32>
    %c0_8 = arith.constant 0 : index
    %c0_9 = arith.constant 0 : index
    %10 = vector.load %arg3[%c0_8, %c0_9] : memref<256x34xbf16, #tpu.memory_space<vmem>>, vector<256x34xbf16>
    %11 = vector.extract_strided_slice %9 {offsets = [0, 0], sizes = [48, 256], strides = [1, 1]} : vector<48x512xf32> to vector<48x256xf32>
    %12 = vector.shape_cast %11 : vector<48x256xf32> to vector<6x8x256xf32>
    %cst_10 = arith.constant dense<0xFF800000> : vector<6x8xf32>
    %13 = vector.multi_reduction <maximumf>, %12, %cst_10 [2] : vector<6x8x256xf32> to vector<6x8xf32>
    %14 = vector.shape_cast %13 : vector<6x8xf32> to vector<6x8x1xf32>
    %cst_11 = arith.constant dense<0xFF800000> : vector<6x1xf32>
    %15 = vector.multi_reduction <maximumf>, %14, %cst_11 [1] : vector<6x8x1xf32> to vector<6x1xf32>
    %16 = vector.shape_cast %15 : vector<6x1xf32> to vector<6x1x1xf32>
    %17 = vector.broadcast %16 : vector<6x1x1xf32> to vector<6x8x256xf32>
    %18 = arith.subf %12, %17 : vector<6x8x256xf32>
    %19 = math.exp %18 : vector<6x8x256xf32>
    %cst_12 = arith.constant dense<0.000000e+00> : vector<6x8xf32>
    %20 = vector.multi_reduction <add>, %19, %cst_12 [2] : vector<6x8x256xf32> to vector<6x8xf32>
    %21 = vector.shape_cast %20 : vector<6x8xf32> to vector<6x8x1xf32>
    %cst_13 = arith.constant dense<0.000000e+00> : vector<6x1xf32>
    %22 = vector.multi_reduction <add>, %21, %cst_13 [1] : vector<6x8x1xf32> to vector<6x1xf32>
    %23 = vector.shape_cast %22 : vector<6x1xf32> to vector<6x1x1xf32>
    %24 = tpu.reciprocal %23 {approx = true} : vector<6x1x1xf32> -> vector<6x1x1xf32>
    %25 = vector.broadcast %24 : vector<6x1x1xf32> to vector<6x8x256xf32>
    %26 = arith.mulf %19, %25 : vector<6x8x256xf32>
    %cst_14 = arith.constant dense<0xFF800000> : vector<6x8xf32>
    %27 = vector.multi_reduction <maximumf>, %26, %cst_14 [2] : vector<6x8x256xf32> to vector<6x8xf32>
    %cst_15 = arith.constant dense<0xFF800000> : vector<6xf32>
    %28 = vector.multi_reduction <maximumf>, %27, %cst_15 [1] : vector<6x8xf32> to vector<6xf32>
    %29 = vector.shape_cast %28 : vector<6xf32> to vector<6x1xf32>
    %cst_16 = arith.constant dense<0.000000e+00> : vector<6x8xf32>
    %30 = vector.multi_reduction <add>, %26, %cst_16 [2] : vector<6x8x256xf32> to vector<6x8xf32>
    %cst_17 = arith.constant dense<0.000000e+00> : vector<6x256xf32>
    %31 = vector.multi_reduction <add>, %26, %cst_17 [1] : vector<6x8x256xf32> to vector<6x256xf32>
    %32 = arith.truncf %31 : vector<6x256xf32> to vector<6x256xbf16>
    %cst_18 = arith.constant dense<0.000000e+00> : vector<6x34xf32>
    %33 = tpu.matmul %32, %10, %cst_18 {dimension_numbers = #tpu.dot_dimension_numbers<[1], [0], [0], [1], [0, 0, 1, 1], [], []>} : vector<6x256xbf16>, vector<256x34xbf16>, vector<6x34xf32> -> vector<6x34xf32>
    %34 = vector.extract_strided_slice %33 {offsets = [0, 0], sizes = [6, 32], strides = [1, 1]} : vector<6x34xf32> to vector<6x32xf32>
    %35 = vector.extract_strided_slice %33 {offsets = [0, 32], sizes = [6, 1], strides = [1, 1]} : vector<6x34xf32> to vector<6x1xf32>
    %cst_19 = arith.constant 6.250000e-02 : f32
    %36 = vector.broadcast %cst_19 : f32 to vector<6x1xf32>
    %37 = arith.mulf %35, %36 : vector<6x1xf32>
    %cst_20 = arith.constant 5.000000e-01 : f32
    %38 = vector.broadcast %cst_20 : f32 to vector<6x1xf32>
    %39 = arith.subf %37, %38 : vector<6x1xf32>
    %40 = vector.extract_strided_slice %33 {offsets = [0, 33], sizes = [6, 1], strides = [1, 1]} : vector<6x34xf32> to vector<6x1xf32>
    %cst_21 = arith.constant 6.250000e-02 : f32
    %41 = vector.broadcast %cst_21 : f32 to vector<6x1xf32>
    %42 = arith.mulf %40, %41 : vector<6x1xf32>
    %cst_22 = arith.constant 5.000000e-01 : f32
    %43 = vector.broadcast %cst_22 : f32 to vector<6x1xf32>
    %44 = arith.subf %42, %43 : vector<6x1xf32>
    %45 = tpu.iota {dimensions = array<i32: 1>} : vector<6x8xi32>
    %46 = arith.sitofp %45 : vector<6x8xi32> to vector<6x8xf32>
    %47 = arith.mulf %30, %46 : vector<6x8xf32>
    %cst_23 = arith.constant dense<0.000000e+00> : vector<6xf32>
    %48 = vector.multi_reduction <add>, %47, %cst_23 [1] : vector<6x8xf32> to vector<6xf32>
    %49 = vector.shape_cast %48 : vector<6xf32> to vector<6x1xf32>
    %cst_24 = arith.constant 1.250000e-01 : f32
    %50 = vector.broadcast %cst_24 : f32 to vector<6x1xf32>
    %51 = arith.mulf %49, %50 : vector<6x1xf32>
    %cst_25 = arith.constant 5.000000e-01 : f32
    %52 = vector.broadcast %cst_25 : f32 to vector<6x1xf32>
    %53 = arith.subf %51, %52 : vector<6x1xf32>
    %cst_26 = arith.constant 0.000000e+00 : f32
    %54 = vector.broadcast %cst_26 : f32 to vector<6x84xf32>
    %55 = tpu.concatenate %34, %30, %39, %44, %53, %29, %54 in 1 : vector<6x32xf32>, vector<6x8xf32>, vector<6x1xf32>, vector<6x1xf32>, vector<6x1xf32>, vector<6x1xf32>, vector<6x84xf32> -> vector<6x128xf32>
    %c0_27 = arith.constant 0 : index
    %c0_28 = arith.constant 0 : index
    %c0_29 = arith.constant 0 : index
    %56 = vector.load %arg4[%c0_27, %c0_28, %c0_29] : memref<2x6x128xf32, #tpu.memory_space<vmem>>, vector<1x6x128xf32>
    %57 = vector.shape_cast %56 : vector<1x6x128xf32> to vector<6x128xf32>
    %58 = vector.shape_cast %55 : vector<6x128xf32> to vector<1x6x128xf32>
    tpu.vector_store %arg4[%c0_27, %c0_28, %c0_29], %58 {strides = array<i32>} : memref<2x6x128xf32, #tpu.memory_space<vmem>>, vector<1x6x128xf32>,
    %59 = vector.extract_strided_slice %9 {offsets = [0, 256], sizes = [48, 256], strides = [1, 1]} : vector<48x512xf32> to vector<48x256xf32>
    %60 = vector.shape_cast %59 : vector<48x256xf32> to vector<6x8x256xf32>
    %cst_30 = arith.constant dense<0xFF800000> : vector<6x8xf32>
    %61 = vector.multi_reduction <maximumf>, %60, %cst_30 [2] : vector<6x8x256xf32> to vector<6x8xf32>
    %62 = vector.shape_cast %61 : vector<6x8xf32> to vector<6x8x1xf32>
    %cst_31 = arith.constant dense<0xFF800000> : vector<6x1xf32>
    %63 = vector.multi_reduction <maximumf>, %62, %cst_31 [1] : vector<6x8x1xf32> to vector<6x1xf32>
    %64 = vector.shape_cast %63 : vector<6x1xf32> to vector<6x1x1xf32>
    %65 = vector.broadcast %64 : vector<6x1x1xf32> to vector<6x8x256xf32>
    %66 = arith.subf %60, %65 : vector<6x8x256xf32>
    %67 = math.exp %66 : vector<6x8x256xf32>
    %cst_32 = arith.constant dense<0.000000e+00> : vector<6x8xf32>
    %68 = vector.multi_reduction <add>, %67, %cst_32 [2] : vector<6x8x256xf32> to vector<6x8xf32>
    %69 = vector.shape_cast %68 : vector<6x8xf32> to vector<6x8x1xf32>
    %cst_33 = arith.constant dense<0.000000e+00> : vector<6x1xf32>
    %70 = vector.multi_reduction <add>, %69, %cst_33 [1] : vector<6x8x1xf32> to vector<6x1xf32>
    %71 = vector.shape_cast %70 : vector<6x1xf32> to vector<6x1x1xf32>
    %72 = tpu.reciprocal %71 {approx = true} : vector<6x1x1xf32> -> vector<6x1x1xf32>
    %73 = vector.broadcast %72 : vector<6x1x1xf32> to vector<6x8x256xf32>
    %74 = arith.mulf %67, %73 : vector<6x8x256xf32>
    %cst_34 = arith.constant dense<0xFF800000> : vector<6x8xf32>
    %75 = vector.multi_reduction <maximumf>, %74, %cst_34 [2] : vector<6x8x256xf32> to vector<6x8xf32>
    %cst_35 = arith.constant dense<0xFF800000> : vector<6xf32>
    %76 = vector.multi_reduction <maximumf>, %75, %cst_35 [1] : vector<6x8xf32> to vector<6xf32>
    %77 = vector.shape_cast %76 : vector<6xf32> to vector<6x1xf32>
    %cst_36 = arith.constant dense<0.000000e+00> : vector<6x8xf32>
    %78 = vector.multi_reduction <add>, %74, %cst_36 [2] : vector<6x8x256xf32> to vector<6x8xf32>
    %cst_37 = arith.constant dense<0.000000e+00> : vector<6x256xf32>
    %79 = vector.multi_reduction <add>, %74, %cst_37 [1] : vector<6x8x256xf32> to vector<6x256xf32>
    %80 = arith.truncf %79 : vector<6x256xf32> to vector<6x256xbf16>
    %cst_38 = arith.constant dense<0.000000e+00> : vector<6x34xf32>
    %81 = tpu.matmul %80, %10, %cst_38 {dimension_numbers = #tpu.dot_dimension_numbers<[1], [0], [0], [1], [0, 0, 1, 1], [], []>} : vector<6x256xbf16>, vector<256x34xbf16>, vector<6x34xf32> -> vector<6x34xf32>
    %82 = vector.extract_strided_slice %81 {offsets = [0, 0], sizes = [6, 32], strides = [1, 1]} : vector<6x34xf32> to vector<6x32xf32>
    %83 = vector.extract_strided_slice %81 {offsets = [0, 32], sizes = [6, 1], strides = [1, 1]} : vector<6x34xf32> to vector<6x1xf32>
    %cst_39 = arith.constant 6.250000e-02 : f32
    %84 = vector.broadcast %cst_39 : f32 to vector<6x1xf32>
    %85 = arith.mulf %83, %84 : vector<6x1xf32>
    %cst_40 = arith.constant 5.000000e-01 : f32
    %86 = vector.broadcast %cst_40 : f32 to vector<6x1xf32>
    %87 = arith.subf %85, %86 : vector<6x1xf32>
    %88 = vector.extract_strided_slice %81 {offsets = [0, 33], sizes = [6, 1], strides = [1, 1]} : vector<6x34xf32> to vector<6x1xf32>
    %cst_41 = arith.constant 6.250000e-02 : f32
    %89 = vector.broadcast %cst_41 : f32 to vector<6x1xf32>
    %90 = arith.mulf %88, %89 : vector<6x1xf32>
    %cst_42 = arith.constant 5.000000e-01 : f32
    %91 = vector.broadcast %cst_42 : f32 to vector<6x1xf32>
    %92 = arith.subf %90, %91 : vector<6x1xf32>
    %93 = tpu.iota {dimensions = array<i32: 1>} : vector<6x8xi32>
    %94 = arith.sitofp %93 : vector<6x8xi32> to vector<6x8xf32>
    %95 = arith.mulf %78, %94 : vector<6x8xf32>
    %cst_43 = arith.constant dense<0.000000e+00> : vector<6xf32>
    %96 = vector.multi_reduction <add>, %95, %cst_43 [1] : vector<6x8xf32> to vector<6xf32>
    %97 = vector.shape_cast %96 : vector<6xf32> to vector<6x1xf32>
    %cst_44 = arith.constant 1.250000e-01 : f32
    %98 = vector.broadcast %cst_44 : f32 to vector<6x1xf32>
    %99 = arith.mulf %97, %98 : vector<6x1xf32>
    %cst_45 = arith.constant 5.000000e-01 : f32
    %100 = vector.broadcast %cst_45 : f32 to vector<6x1xf32>
    %101 = arith.subf %99, %100 : vector<6x1xf32>
    %cst_46 = arith.constant 0.000000e+00 : f32
    %102 = vector.broadcast %cst_46 : f32 to vector<6x84xf32>
    %103 = tpu.concatenate %82, %78, %87, %92, %101, %77, %102 in 1 : vector<6x32xf32>, vector<6x8xf32>, vector<6x1xf32>, vector<6x1xf32>, vector<6x1xf32>, vector<6x1xf32>, vector<6x84xf32> -> vector<6x128xf32>
    %c1_47 = arith.constant 1 : index
    %c0_48 = arith.constant 0 : index
    %c0_49 = arith.constant 0 : index
    %104 = vector.load %arg4[%c1_47, %c0_48, %c0_49] : memref<2x6x128xf32, #tpu.memory_space<vmem>>, vector<1x6x128xf32>
    %105 = vector.shape_cast %104 : vector<1x6x128xf32> to vector<6x128xf32>
    %106 = vector.shape_cast %103 : vector<6x128xf32> to vector<1x6x128xf32>
    tpu.vector_store %arg4[%c1_47, %c0_48, %c0_49], %106 {strides = array<i32>} : memref<2x6x128xf32, #tpu.memory_space<vmem>>, vector<1x6x128xf32>,
    return
  }
}

</mosaic_0001>

<bundles_post_ra>
// kernel: simplepose3d_forward.2
= control target key start
LH: loop header
LB: loop body
LE: loop exit
PB: predicated region body
PF: predicated region fallthrough
CT: control target
= control target key end

     0   :  { %vm629_vm0 = vcmask 523264   ;;  %s1084_s1 = inlined_call_operand.vmem [shape: bf16[768,64], index: 1, kind: input, shape index: {}]   ;;  %s1085_s0 = inlined_call_operand.vmem [shape: bf16[32,768], index: 0, kind: input, shape index: {}]   ;;  %s1086_s2 = inlined_call_operand.vmem [shape: f32[1,64], index: 2, kind: input, shape index: {}]   ;;  %s1087_s3 = inlined_call_operand.vmem [shape: f32[32,64], index: 3, kind: output, shape index: {}]  }
   0x1   :  { %v799_v0 = vld [vmem:[%s1084_s1 + $0x78] sm:$0xff]   ;;  %v803_v4 = vld [vmem:[%s1084_s1 + $0x70] sm:$0xff]   ;;  %v807_v8 = vld [vmem:[%s1084_s1 + $0x68] sm:$0xff]  }
   0x2   :  { %v800_v1 = vld [vmem:[%s1084_s1 + $0xf8] sm:$0xff]   ;;  %699 = vmatprep.subr.bf16.mxu0 %v799_v0  ;;  %v804_v5 = vld [vmem:[%s1084_s1 + $0xf0] sm:$0xff]   ;;  %v808_v9 = vld [vmem:[%s1084_s1 + $0xe8] sm:$0xff]  }
   0x3   :  { %v801_v2 = vld [vmem:[%s1084_s1 + $0x38] sm:$0xff]   ;;  %727 = vmatprep.subr.bf16.mxu1 %v800_v1  ;;  %v805_v6 = vld [vmem:[%s1084_s1 + $0x30] sm:$0xff]   ;;  %v809_v10 = vld [vmem:[%s1084_s1 + $0x28] sm:$0xff]  }
   0x4   :  { %v802_v3 = vld [vmem:[%s1084_s1 + $0xb8] sm:$0xff]   ;;  %700 = vmatpush3.bf16.msra.mxu0 %v801_v2  ;;  %v806_v7 = vld [vmem:[%s1084_s1 + $0xb0] sm:$0xff]   ;;  %v810_v11 = vld [vmem:[%s1084_s1 + $0xa8] sm:$0xff]  }
   0x5   :  { %728 = vmatpush3.bf16.msra.mxu1 %v802_v3  ;;  %701 = vmatprep.subr.bf16.mxu0 %v803_v4  ;;  %v811_v12 = vld [vmem:[%s1084_s1 + $0x60] sm:$0xff]   ;;  %v815_v16 = vld [vmem:[%s1084_s1 + $0x58] sm:$0xff]   ;;  %v819_v20 = vld [vmem:[%s1084_s1 + $0x50] sm:$0xff]  }
   0x6   :  { %729 = vmatprep.subr.bf16.mxu1 %v804_v5  ;;  %v812_v13 = vld [vmem:[%s1084_s1 + $0xe0] sm:$0xff]   ;;  %v816_v17 = vld [vmem:[%s1084_s1 + $0xd8] sm:$0xff]   ;;  %v820_v21 = vld [vmem:[%s1084_s1 + $0xd0] sm:$0xff]  }
   0x7   :  { %v813_v14 = vld [vmem:[%s1084_s1 + $0x20] sm:$0xff]   ;;  %v817_v18 = vld [vmem:[%s1084_s1 + $0x18] sm:$0xff]   ;;  %v821_v22 = vld [vmem:[%s1084_s1 + $0x10] sm:$0xff]  }
   0x8   :  { %702 = vmatpush3.bf16.msra.mxu0 %v805_v6  ;;  %v814_v15 = vld [vmem:[%s1084_s1 + $0xa0] sm:$0xff]   ;;  %v818_v19 = vld [vmem:[%s1084_s1 + $0x98] sm:$0xff]   ;;  %v822_v23 = vld [vmem:[%s1084_s1 + $0x90] sm:$0xff]  }
   0x9   :  { %730 = vmatpush3.bf16.msra.mxu1 %v806_v7  ;;  %703 = vmatprep.subr.bf16.mxu0 %v807_v8  ;;  %v823_v24 = vld [vmem:[%s1084_s1 + $0x48] sm:$0xff]   ;;  %v827_v28 = vld [vmem:[%s1084_s1 + $0x40] sm:$0xff]   ;;  %v837_v36 = vld [vmem:[%s1084_s1 + $0x178] sm:$0xff]  }
   0xa   :  { %731 = vmatprep.subr.bf16.mxu1 %v808_v9  ;;  %v824_v25 = vld [vmem:[%s1084_s1 + $0xc8] sm:$0xff]   ;;  %v828_v29 = vld [vmem:[%s1084_s1 + $0xc0] sm:$0xff]   ;;  %v838_v37 = vld [vmem:[%s1084_s1 + $0x138] sm:$0xff]  }
   0xb   :  { %v825_v26 = vld [vmem:[%s1084_s1 + $0x8] sm:$0xff]   ;;  %v829_v30 = vld [vmem:[%s1084_s1] sm:$0xff]   ;;  %v839_v38 = vld [vmem:[%s1084_s1 + $0x170] sm:$0xff]  }
   0xc   :  { %704 = vmatpush3.bf16.msra.mxu0 %v809_v10  ;;  %v826_v27 = vld [vmem:[%s1084_s1 + $0x88] sm:$0xff]   ;;  %v830_v31 = vld [vmem:[%s1084_s1 + $0x80] sm:$0xff]   ;;  %v840_v39 = vld [vmem:[%s1084_s1 + $0x130] sm:$0xff]  }
   0xd   :  { %732 = vmatpush3.bf16.msra.mxu1 %v810_v11  ;;  %705 = vmatprep.subr.bf16.mxu0 %v811_v12  ;;  %v831_v32 = vld [vmem:[%s1085_s0] ss:$24 sps:$4 sm:$0xff]   ;;  %v833_v33 = vld [vmem:[%s1085_s0 + $0x4] ss:$24 sps:$4 sm:$0xff]   ;;  %v841_v40 = vld [vmem:[%s1084_s1 + $0x168] sm:$0xff]  }
   0xe   :  { %733 = vmatprep.subr.bf16.mxu1 %v812_v13  ;;  %v834_v34 = vld [vmem:[%s1085_s0 + $0x8] ss:$24 sps:$4 sm:$0xff]   ;;  %v836_v35 = vld [vmem:[%s1085_s0 + $0xc] ss:$24 sps:$4 sm:$0xff]   ;;  %510 = vmatprep.mubr.bf16.mxu0 %v833_v33  ;;  %v849_v46 = vld [vmem:[%s1085_s0 + $0x3c] ss:$24 sps:$4 sm:$0xff]  }
   0xf   :  { %559 = vmatprep.mubr.bf16.mxu1 %v836_v35  ;;  %v842_v41 = vld [vmem:[%s1084_s1 + $0x128] sm:$0xff]   ;;  %v843_v42 = vld [vmem:[%s1084_s1 + $0x160] sm:$0xff]   ;;  %v848_v47 = vld [vmem:[%s1084_s1 + $0x158] sm:$0xff]  }
  0x10   :  { %706 = vmatpush3.bf16.msra.mxu0 %v813_v14  ;;  %v845_v43 = vld [vmem:[%s1085_s0 + $0x34] ss:$24 sps:$4 sm:$0xff]   ;;  %v844_v44 = vld [vmem:[%s1084_s1 + $0x120] sm:$0xff]   ;;  %v847_v45 = vld [vmem:[%s1085_s0 + $0x30] ss:$24 sps:$4 sm:$0xff]  }
  0x11   :  { %734 = vmatpush3.bf16.msra.mxu1 %v814_v15  ;;  %707 = vmatprep.subr.bf16.mxu0 %v815_v16  ;;  %v852_v48 = vld [vmem:[%s1085_s0 + $0x38] ss:$24 sps:$4 sm:$0xff]   ;;  %v861_v52 = vld [vmem:[%s1085_s0 + $0x14] ss:$24 sps:$4 sm:$0xff]   ;;  %v864_v54 = vld [vmem:[%s1085_s0 + $0x44] ss:$24 sps:$4 sm:$0xff]  }
  0x12   :  { %735 = vmatprep.subr.bf16.mxu1 %v816_v17  ;;  %v851_v49 = vld [vmem:[%s1084_s1 + $0x118] sm:$0xff]   ;;  %v853_v50 = vld [vmem:[%s1084_s1 + $0x150] sm:$0xff]   ;;  %v855_v53 = vld [vmem:[%s1084_s1 + $0x148] sm:$0xff]  }
  0x13   :  { %v854_v51 = vld [vmem:[%s1084_s1 + $0x110] sm:$0xff]   ;;  %v856_v55 = vld [vmem:[%s1084_s1 + $0x108] sm:$0xff]   ;;  %v857_v56 = vld [vmem:[%s1084_s1 + $0x140] sm:$0xff]  }
  0x14   :  { %708 = vmatpush3.bf16.msra.mxu0 %v817_v18  ;;  %v858_v57 = vld [vmem:[%s1084_s1 + $0x100] sm:$0xff]   ;;  %v859_v58 = vld [vmem:[%s1085_s0 + $0x10] ss:$24 sps:$4 sm:$0xff]  }
  0x15   :  { %736 = vmatpush3.bf16.msra.mxu1 %v818_v19  ;;  %709 = vmatprep.subr.bf16.mxu0 %v819_v20  ;;  %v862_v59 = vld [vmem:[%s1085_s0 + $0x40] ss:$24 sps:$4 sm:$0xff]  }
  0x16   :  { %737 = vmatprep.subr.bf16.mxu1 %v820_v21  ;;  %v638_v11 = vld [vmem:[%s1086_s2] ss:$0 sm:$0xff] }
  0x18   :  { %710 = vmatpush3.bf16.msra.mxu0 %v821_v22 }
  0x19   :  { %738 = vmatpush3.bf16.msra.mxu1 %v822_v23  ;;  %711 = vmatprep.subr.bf16.mxu0 %v823_v24 }
  0x1a   :  { %739 = vmatprep.subr.bf16.mxu1 %v824_v25 }
  0x1c   :  { %712 = vmatpush3.bf16.msra.mxu0 %v825_v26 }
  0x1d   :  { %740 = vmatpush3.bf16.msra.mxu1 %v826_v27  ;;  %713 = vmatprep.subr.bf16.mxu0 %v827_v28 }
  0x1e   :  { %741 = vmatprep.subr.bf16.mxu1 %v828_v29 }
  0x20   :  { %714 = vmatpush3.bf16.msra.mxu0 %v829_v30 }
  0x21   :  { %742 = vmatpush3.bf16.msra.mxu1 %v830_v31  ;;  %755 = vmatprep.subr.bf16.mxu0 %v837_v36 }
  0x22   :  { %783 = vmatprep.subr.bf16.mxu1 %v837_v36 }
  0x23   :  { %511 = vmatmul.mubr.bf16.vlgmr.msra.gmra.mxu0 %v831_v32 }
  0x24   :  { %560 = vmatmul.mubr.bf16.vlgmr.msra.gmra.mxu1 %v834_v34  ;;  %756 = vmatpush3.bf16.msra.mxu0 %v838_v37 }
  0x25   :  { %791 = vmatpush3.bf16.msra.mxu1 %v838_v37  ;;  %757 = vmatprep.subr.bf16.mxu0 %v839_v38 }
  0x26   :  { %784 = vmatprep.subr.bf16.mxu1 %v839_v38  ;;  %518 = vmatprep.mubr.bf16.mxu0 %v845_v43 }
  0x27   :  { %567 = vmatprep.mubr.bf16.mxu1 %v849_v46 }
  0x28   :  { %758 = vmatpush3.bf16.msra.mxu0 %v840_v39 }
  0x29   :  { %792 = vmatpush3.bf16.msra.mxu1 %v840_v39  ;;  %759 = vmatprep.subr.bf16.mxu0 %v841_v40 }
  0x2a   :  { %785 = vmatprep.subr.bf16.mxu1 %v841_v40 }
  0x2b   :  { %519 = vmatmul.mubr.bf16.gmra.mxu0 %v847_v45 }
  0x2c   :  { %760 = vmatpush3.bf16.msra.mxu0 %v842_v41  ;;  %568 = vmatmul.mubr.bf16.gmra.mxu1 %v852_v48 }
  0x2d   :  { %793 = vmatpush3.bf16.msra.mxu1 %v842_v41  ;;  %761 = vmatprep.subr.bf16.mxu0 %v843_v42 }
  0x2e   :  { %786 = vmatprep.subr.bf16.mxu1 %v843_v42  ;;  %608 = vmatprep.mubr.bf16.mxu0 %v861_v52 }
  0x2f   :  { %616 = vmatprep.mubr.bf16.mxu1 %v864_v54 }
  0x30   :  { %762 = vmatpush3.bf16.msra.mxu0 %v844_v44 }
  0x31   :  { %794 = vmatpush3.bf16.msra.mxu1 %v844_v44  ;;  %763 = vmatprep.subr.bf16.mxu0 %v848_v47 }
  0x32   :  { %787 = vmatprep.subr.bf16.mxu1 %v848_v47 }
  0x34   :  { %764 = vmatpush3.bf16.msra.mxu0 %v851_v49 }
  0x35   :  { %795 = vmatpush3.bf16.msra.mxu1 %v851_v49  ;;  %765 = vmatprep.subr.bf16.mxu0 %v853_v50 }
  0x36   :  { %788 = vmatprep.subr.bf16.mxu1 %v853_v50 }
  0x38   :  { %766 = vmatpush3.bf16.msra.mxu0 %v854_v51 }
  0x39   :  { %796 = vmatpush3.bf16.msra.mxu1 %v854_v51  ;;  %767 = vmatprep.subr.bf16.mxu0 %v855_v53 }
  0x3a   :  { %789 = vmatprep.subr.bf16.mxu1 %v855_v53 }
  0x3c   :  { %768 = vmatpush3.bf16.msra.mxu0 %v856_v55 }
  0x3d   :  { %797 = vmatpush3.bf16.msra.mxu1 %v856_v55  ;;  %769 = vmatprep.subr.bf16.mxu0 %v857_v56 }
  0x3e   :  { %790 = vmatprep.subr.bf16.mxu1 %v857_v56 }
  0x40   :  { %770 = vmatpush3.bf16.msra.mxu0 %v858_v57 }
  0x41   :  { %798 = vmatpush3.bf16.msra.mxu1 %v858_v57 }
  0x43   :  { %609 = vmatmul.mubr.bf16.vlgmr.msra.gmra.mxu0 %v859_v58 }
  0x44   :  { %617 = vmatmul.mubr.bf16.vlgmr.msra.gmra.mxu1 %v862_v59 }
  0xe3   :  { %v715_v60 = vpop.f32.mrf.mxu0 }
  0xe4   :  { %v743_v61 = vpop.f32.mrf.mxu1 }
  0xe5   :  { %v716_v62 = vpop.f32.mrf.mxu0 }
  0xe6   :  { %v744_v63 = vpop.f32.mrf.mxu1  ;;  %v717_v9 = vadd.f32 %v716_v62, %v715_v60 }
  0xe7   :  { %v718_v0 = vpop.f32.mrf.mxu0  ;;  %v745_v21 = vadd.f32 %v744_v63, %v743_v61 }
  0xe8   :  { %v746_v1 = vpop.f32.mrf.mxu1  ;;  %v513_v14 = vadd.f32 %v717_v9, %v638_v11 }
  0xe9   :  { %v719_v2 = vpop.f32.mrf.mxu0 }
  0xea   :  { %v747_v3 = vpop.f32.mrf.mxu1  ;;  %v720_v15 = vadd.f32 %v719_v2, %v718_v0  ;;  %v562_v24 = vadd.f32 %v745_v21, %v513_v14 }
  0xeb   :  { %v721_v4 = vpop.f32.mrf.mxu0  ;;  %v748_v33 = vadd.f32 %v747_v3, %v746_v1 }
  0xec   :  { %v749_v5 = vpop.f32.mrf.mxu1  ;;  %v516_v25 = vadd.f32 %v720_v15, %v638_v11 }
  0xed   :  { %v722_v6 = vpop.f32.mrf.mxu0 }
  0xee   :  { %v750_v7 = vpop.f32.mrf.mxu1  ;;  %v723_v12 = vadd.f32 %v722_v6, %v721_v4  ;;  %v565_v38 = vadd.f32 %v748_v33, %v516_v25 }
  0xef   :  { %v724_v8 = vpop.f32.mrf.mxu0  ;;  %v751_v18 = vadd.f32 %v750_v7, %v749_v5 }
  0xf0   :  { %v752_v10 = vpop.f32.mrf.mxu1  ;;  %v521_v17 = vadd.f32 %v723_v12, %v638_v11 }
  0xf1   :  { %v725_v13 = vpop.f32.mrf.mxu0 }
  0xf2   :  { %v753_v16 = vpop.f32.mrf.mxu1  ;;  %v726_v19 = vadd.f32 %v725_v13, %v724_v8  ;;  %v570_v28 = vadd.f32 %v751_v18, %v521_v17 }
  0xf3   :  { %v754_v30 = vadd.f32 %v753_v16, %v752_v10 }
  0xf4   :  { %v524_v29 = vadd.f32 %v726_v19, %v638_v11 }
  0xf6   :  { %v573_v42 = vadd.f32 %v754_v30, %v524_v29 }
 0x103   :  { %v771_v20 = vpop.f32.mrf.mxu0 }
 0x104   :  { %v777_v22 = vpop.f32.mrf.mxu1 }
 0x105   :  { %v772_v23 = vpop.f32.mrf.mxu0 }
 0x106   :  { %v773_v26 = vadd.f32 %v772_v23, %v771_v20  ;;  %v778_v27 = vpop.f32.mrf.mxu1 }
 0x107   :  { %v779_v31 = vadd.f32 %v778_v27, %v777_v22  ;;  %v774_v32 = vpop.f32.mrf.mxu0 }
 0x108   :  { %v611_v34 = vadd.f32 %v773_v26, %v562_v24  ;;  %v780_v35 = vpop.f32.mrf.mxu1 }
 0x109   :  { %v619_v36 = vadd.f32 %v779_v31, %v570_v28  ;;  %v775_v37 = vpop.f32.mrf.mxu0 }
 0x10a   :  { %v625_v39 = vmax.f32 %v611_v34, 0.0  ;;  %v776_v40 = vadd.f32 %v775_v37, %v774_v32  ;;  %v781_v41 = vpop.f32.mrf.mxu1 }
 0x10b   :  { %v627_v43 = vmax.f32 %v619_v36, 0.0  ;;  %v782_v44 = vadd.f32 %v781_v41, %v780_v35 }
 0x10c   :  { %630 = vst.msk [vmem:[%s1087_s3] sm:$0xff] %vm629_vm0, %v625_v39  ;;  %v614_v45 = vadd.f32 %v776_v40, %v565_v38 }
 0x10d   :  { %632 = vst.msk [vmem:[%s1087_s3 + $0x10] sm:$0xff] %vm629_vm0, %v627_v43  ;;  %v622_v46 = vadd.f32 %v782_v44, %v573_v42 }
 0x10e   :  { %v626_v47 = vmax.f32 %v614_v45, 0.0 }
 0x10f   :  { %v628_v48 = vmax.f32 %v622_v46, 0.0 }
 0x110   :  { %631 = vst.msk [vmem:[%s1087_s3 + $0x8] sm:$0xff] %vm629_vm0, %v626_v47 }
 0x111   :  { %633 = vst.msk [vmem:[%s1087_s3 + $0x18] sm:$0xff] %vm629_vm0, %v628_v48 }

// kernel: simplepose3d_forward.3
= control target key start
LH: loop header
LB: loop body
LE: loop exit
PB: predicated region body
PF: predicated region fallthrough
CT: control target
= control target key end

     0   :  { %v1632_v1 = vmov 0   ;;  %vm124_vm0 = vcmask 261120   ;;  %vm504_vm1 = vcmask 1041409   ;;  %vm506_vm2 = vcmask 1042434   ;;  %s2289_s0 = inlined_call_operand.vmem [shape: bf16[2,32,256], index: 0, kind: input, shape index: {}]   ;;  %s2290_s1 = inlined_call_operand.vmem [shape: bf16[48,32], index: 1, kind: input, shape index: {}]   ;;  %s2291_s2 = inlined_call_operand.vmem [shape: f32[48,1], index: 2, kind: input, shape index: {}]   ;;  %s2292_s3 = inlined_call_operand.vmem [shape: bf16[256,34], index: 3, kind: input, shape index: {}]   ;;  %s2293_s4 = inlined_call_operand.vmem [shape: f32[2,6,128], index: 4, kind: output, shape index: {}]  }
   0x1   :  { %v1529_v0 = vld [vmem:[%s2289_s0 + $0x14] ss:$8 sps:$4 sm:$0xff]   ;;  %166 = vmatprep.mubr.bf16.mxu0 %v1632_v1  ;;  %229 = vmatprep.mubr.bf16.mxu1 %v1632_v1  ;;  %v1533_v3 = vld [vmem:[%s2289_s0 + $0x10] ss:$8 sps:$4 sm:$0xff]   ;;  %v1535_v5 = vld [vmem:[%s2289_s0 + $0x4] ss:$8 sps:$4 sm:$0xff]  }
   0x2   :  { %v1531_v2 = vld [vmem:[%s2289_s0 + $0x34] ss:$8 sps:$4 sm:$0xff]   ;;  %1527 = vset.pattern.permute.xlu0 %v1632_v1  ;;  %1528 = vset.pattern.permute.xlu1 %v1632_v1  ;;  %v1534_v4 = vld [vmem:[%s2289_s0 + $0x30] ss:$8 sps:$4 sm:$0xff]   ;;  %v1537_v6 = vld [vmem:[%s2289_s0 + $0x24] ss:$8 sps:$4 sm:$0xff]  }
   0x3   :  { %146 = vmatprep.subr.bf16.mxu0 %v1529_v0  ;;  %209 = vmatprep.subr.bf16.mxu1 %v1531_v2  ;;  %v1539_v7 = vld [vmem:[%s2289_s0] ss:$8 sps:$4 sm:$0xff]   ;;  %v75_v11 = vld [vmem:[%s2291_s2 + $0x10] sm:$0xff]  ;;  %v76_v13 = vld [vmem:[%s2291_s2 + $0x18] sm:$0xff]  ;;  %vm508_vm3 = vcmask 1043459   ;;  %vm510_vm4 = vcmask 1044484  }
   0x4   :  { %147 = vmatpush1.bf16.msra.mxu0 %v1533_v3  ;;  %210 = vmatpush1.bf16.msra.mxu1 %v1534_v4  ;;  %v1540_v8 = vld [vmem:[%s2289_s0 + $0x20] ss:$8 sps:$4 sm:$0xff]   ;;  %v1543_v17 = vld [vmem:[%s2290_s1 + $0x10] sm:$0xff]   ;;  %vm512_vm5 = vcmask 1045509   ;;  %vm515_vm6 = vcmask 62464   ;;  %vm910_vm7 = vcmask 326656  }
   0x5   :  { %148 = vmatprep.subr.bf16.mxu0 %v1535_v5  ;;  %211 = vmatprep.subr.bf16.mxu1 %v1537_v6  ;;  %v1541_v9 = vld [vmem:[%s2290_s1] sm:$0xff]   ;;  %v74_v12 = vld [vmem:[%s2291_s2 + $0x8] sm:$0xff]  ;;  %vm912_vm8 = vcmask 334848   ;;  %vm914_vm9 = vcmask 343040   ;;  %vm916_vm10 = vcmask 351232   ;;  %vm918_vm11 = vcmask 359424  }
   0x6   :  { %v73_v10 = vld [vmem:[%s2291_s2] sm:$0xff]  ;;  %91 = vperm.xlu1 %1528, %v75_v11   ;;  %v1542_v15 = vld [vmem:[%s2290_s1 + $0x8] sm:$0xff]  }
   0x7   :  { %81 = vperm.xlu0 %1527, %v73_v10   ;;  %v77_v14 = vld [vmem:[%s2291_s2 + $0x20] sm:$0xff]  ;;  %v78_v16 = vld [vmem:[%s2291_s2 + $0x28] sm:$0xff] }
   0x8   :  { %149 = vmatpush1.bf16.msra.mxu0 %v1539_v7  ;;  %212 = vmatpush1.bf16.msra.mxu1 %v1540_v8 }
   0xa   :  { %96 = vperm.xlu1 %1528, %v76_v13  }
   0xb   :  { %1454 = vmatmul.mubr.msk.bf16.vlgmr.msra.gmra.mxu0 %vm124_vm0, %v1541_v9  ;;  %1457 = vmatmul.mubr.msk.bf16.vlgmr.msra.gmra.mxu1 %vm124_vm0, %v1541_v9 }
   0xc   :  { %176 = vmatprep.mubr.bf16.mxu0 %v1632_v1  ;;  %239 = vmatprep.mubr.bf16.mxu1 %v1632_v1 }
   0xd   :  { %86 = vperm.xlu0 %1527, %v74_v12  }
   0xe   :  { %106 = vperm.xlu1 %1528, %v78_v16  }
  0x11   :  { %101 = vperm.xlu0 %1527, %v77_v14  }
  0x13   :  { %1455 = vmatmul.mubr.msk.bf16.gmra.mxu0 %vm124_vm0, %v1542_v15  ;;  %1458 = vmatmul.mubr.msk.bf16.gmra.mxu1 %vm124_vm0, %v1542_v15 }
  0x14   :  { %186 = vmatprep.mubr.bf16.mxu0 %v1632_v1  ;;  %249 = vmatprep.mubr.bf16.mxu1 %v1632_v1 }
  0x1b   :  { %1456 = vmatmul.mubr.msk.bf16.gmra.mxu0 %vm124_vm0, %v1543_v17  ;;  %1459 = vmatmul.mubr.msk.bf16.gmra.mxu1 %vm124_vm0, %v1543_v17 }
  0x81   :  { %v92_v25 = vpop.permute.xlu1 %91 }
  0x82   :  { %v82_v18 = vpop.permute.xlu0 %81 }
  0x85   :  { %v97_v41 = vpop.permute.xlu1 %96 }
  0x88   :  { %v87_v28 = vpop.permute.xlu0 %86 }
  0x89   :  { %v107_v6 = vpop.permute.xlu1 %106 }
  0x8c   :  { %v102_v60 = vpop.permute.xlu0 %101 }
  0xcb   :  { %v168_v19 = vpop.f32.mrf.mxu0  ;;  %v231_v20 = vpop.f32.mrf.mxu1 }
  0xcc   :  { %v1716_v23 = vadd.f32 %v168_v19, %v82_v18  ;;  %v1720_v29 = vadd.f32 %v231_v20, %v82_v18  ;;  %v478_v20 = vlaneseq }
  0xcd   :  { %v170_v21 = vpop.f32.mrf.mxu0  ;;  %v233_v22 = vpop.f32.mrf.mxu1 }
  0xce   :  { %v1718_v24 = vadd.f32 %v170_v21, %v82_v18  ;;  %v1722_v30 = vadd.f32 %v233_v22, %v82_v18  ;;  %v1788_v21 = vand.u32 127, %v478_v20  ;;  %v481_v22 = vshrl.u32 %v478_v20, 7 }
  0xcf   :  { %v172_v26 = vpop.f32.mrf.mxu0  ;;  %v235_v27 = vpop.f32.mrf.mxu1 }
  0xd0   :  { %v292_v31 = vmax.f32 %v1716_v23, %v1718_v24  ;;  %v1726_v34 = vadd.f32 %v172_v26, %v87_v28  ;;  %v921_v40 = vmax.f32 %v1720_v29, %v1722_v30  ;;  %v1738_v43 = vadd.f32 %v235_v27, %v87_v28 }
  0xd1   :  { %v174_v32 = vpop.f32.mrf.mxu0  ;;  %v237_v33 = vpop.f32.mrf.mxu1  ;;  %v874_v26 = vadd.s32 4294967264, %v1788_v21 }
  0xd2   :  { %v1728_v35 = vadd.f32 %v174_v32, %v87_v28  ;;  %293 = vmax.xlane.f32.xlu0 %v292_v31  ;;  %v1730_v38 = vadd.f32 %v237_v33, %v87_v28 }
  0xd3   :  { %v178_v36 = vpop.f32.mrf.mxu0  ;;  %v241_v37 = vpop.f32.mrf.mxu1  ;;  %v1794_v27 = vsub.s32 %v874_v26, %v481_v22 }
  0xd4   :  { %v295_v39 = vmax.f32 %v1726_v34, %v1728_v35  ;;  %v1736_v42 = vadd.f32 %v178_v36, %v92_v25  ;;  %v1744_v48 = vadd.f32 %v241_v37, %v92_v25  ;;  %v924_v52 = vmax.f32 %v1738_v43, %v1730_v38 }
  0xd5   :  { %v180_v44 = vpop.f32.mrf.mxu0  ;;  %v243_v45 = vpop.f32.mrf.mxu1 }
  0xd6   :  { %v1740_v46 = vadd.f32 %v180_v44, %v92_v25  ;;  %v1742_v47 = vadd.f32 %v243_v45, %v92_v25  ;;  %296 = vmax.xlane.f32.xlu1 %v295_v39  ;;  %922 = vmax.xlane.f32.xlu0 %v921_v40  ;;  %v1791_v25 = vsub.s32 %v1788_v21, %v481_v22 }
  0xd7   :  { %v182_v49 = vpop.f32.mrf.mxu0  ;;  %v245_v50 = vpop.f32.mrf.mxu1 }
  0xd8   :  { %v298_v51 = vmax.f32 %v1736_v42, %v1740_v46  ;;  %v1750_v53 = vadd.f32 %v182_v49, %v97_v41  ;;  %v927_v57 = vmax.f32 %v1744_v48, %v1742_v47  ;;  %v1760_v63 = vadd.f32 %v245_v50, %v97_v41 }
  0xd9   :  { %v184_v54 = vpop.f32.mrf.mxu0  ;;  %v247_v55 = vpop.f32.mrf.mxu1 }
  0xda   :  { %v1752_v56 = vadd.f32 %v184_v54, %v97_v41  ;;  %299 = vmax.xlane.f32.xlu1 %v298_v51  ;;  %925 = vmax.xlane.f32.xlu0 %v924_v52  ;;  %v1756_v61 = vadd.f32 %v247_v55, %v97_v41 }
  0xdb   :  { %v188_v58 = vpop.f32.mrf.mxu0  ;;  %v251_v59 = vpop.f32.mrf.mxu1 }
  0xdc   :  { %v301_v62 = vmax.f32 %v1750_v53, %v1752_v56  ;;  %v1762_v2 = vadd.f32 %v188_v58, %v102_v60  ;;  %v930_v9 = vmax.f32 %v1760_v63, %v1756_v61  ;;  %v1772_v12 = vadd.f32 %v251_v59, %v102_v60 }
  0xdd   :  { %v190_v0 = vpop.f32.mrf.mxu0  ;;  %v253_v1 = vpop.f32.mrf.mxu1 }
  0xde   :  { %v1764_v3 = vadd.f32 %v190_v0, %v102_v60  ;;  %302 = vmax.xlane.f32.xlu1 %v301_v62  ;;  %928 = vmax.xlane.f32.xlu0 %v927_v57  ;;  %v1766_v7 = vadd.f32 %v253_v1, %v102_v60 }
  0xdf   :  { %v192_v4 = vpop.f32.mrf.mxu0  ;;  %v255_v5 = vpop.f32.mrf.mxu1 }
  0xe0   :  { %v304_v8 = vmax.f32 %v1762_v2, %v1764_v3  ;;  %v1774_v13 = vadd.f32 %v192_v4, %v107_v6  ;;  %v933_v17 = vmax.f32 %v1772_v12, %v1766_v7  ;;  %v1784_v18 = vadd.f32 %v255_v5, %v107_v6 }
  0xe1   :  { %v194_v10 = vpop.f32.mrf.mxu0  ;;  %v257_v11 = vpop.f32.mrf.mxu1 }
  0xe2   :  { %v1776_v14 = vadd.f32 %v194_v10, %v107_v6  ;;  %305 = vmax.xlane.f32.xlu1 %v304_v8  ;;  %931 = vmax.xlane.f32.xlu0 %v930_v9  ;;  %v1778_v15 = vadd.f32 %v257_v11, %v107_v6 }
  0xe4   :  { %v307_v16 = vmax.f32 %v1774_v13, %v1776_v14  ;;  %v936_v19 = vmax.f32 %v1784_v18, %v1778_v15 }
  0xe6   :  { %308 = vmax.xlane.f32.xlu1 %v307_v16  ;;  %934 = vmax.xlane.f32.xlu0 %v933_v17 }
  0xea   :  { %937 = vmax.xlane.f32.xlu0 %v936_v19 }
 0x15b   :  { %v294_v28 = vpop.xlane.xlu0 %293 }
 0x15c   :  { %v310_v31 = vrot.slane %v294_v28, 4 }
 0x15e   :  { %v311_v32 = vmax.f32 %v294_v28, %v310_v31 }
 0x15f   :  { %v297_v33 = vpop.xlane.xlu1 %296  ;;  %v923_v36 = vpop.xlane.xlu0 %922 }
 0x160   :  { %v312_v37 = vrot.slane %v311_v32, 2  ;;  %v316_v39 = vrot.slane %v297_v33, 4  ;;  %v939_v40 = vrot.slane %v923_v36, 4 }
 0x162   :  { %v313_v41 = vmax.f32 %v311_v32, %v312_v37  ;;  %v317_v44 = vmax.f32 %v297_v33, %v316_v39  ;;  %v940_v45 = vmax.f32 %v923_v36, %v939_v40 }
 0x163   :  { %v300_v49 = vpop.xlane.xlu1 %299  ;;  %v926_v50 = vpop.xlane.xlu0 %925 }
 0x164   :  { %v314_v51 = vrot.slane %v313_v41, 1  ;;  %v318_v52 = vrot.slane %v317_v44, 2  ;;  %v941_v54 = vrot.slane %v940_v45, 2  ;;  %v322_v55 = vrot.slane %v300_v49, 4 }
 0x165   :  { %v945_v57 = vrot.slane %v926_v50, 4 }
 0x166   :  { %v315_v58 = vmax.f32 %v313_v41, %v314_v51  ;;  %v319_v59 = vmax.f32 %v317_v44, %v318_v52  ;;  %v942_v60 = vmax.f32 %v940_v45, %v941_v54  ;;  %v323_v62 = vmax.f32 %v300_v49, %v322_v55 }
 0x167   :  { %v946_v0 = vmax.f32 %v926_v50, %v945_v57  ;;  %v303_v1 = vpop.xlane.xlu1 %302  ;;  %v929_v4 = vpop.xlane.xlu0 %928 }
 0x168   :  { %v346_v5 = vsub.f32 %v1716_v23, %v315_v58  ;;  %v347_v6 = vsub.f32 %v1718_v24, %v315_v58  ;;  %v320_v8 = vrot.slane %v319_v59, 1  ;;  %v943_v9 = vrot.slane %v942_v60, 1 }
 0x169   :  { %v324_v10 = vrot.slane %v323_v62, 2  ;;  %v947_v11 = vrot.slane %v946_v0, 2  ;;  %v328_v16 = vrot.slane %v303_v1, 4  ;;  %v951_v17 = vrot.slane %v929_v4, 4 }
 0x16a   :  { %v358_v19 = vmul.f32 1.442695, %v346_v5  ;;  %v360_v20 = vmul.f32 1.442695, %v347_v6  ;;  %v321_v22 = vmax.f32 %v319_v59, %v320_v8  ;;  %v944_v26 = vmax.f32 %v942_v60, %v943_v9 }
 0x16b   :  { %v325_v28 = vmax.f32 %v323_v62, %v324_v10  ;;  %v948_v31 = vmax.f32 %v946_v0, %v947_v11  ;;  %v329_v32 = vmax.f32 %v303_v1, %v328_v16  ;;  %v952_v33 = vmax.f32 %v929_v4, %v951_v17  ;;  %v306_v37 = vpop.xlane.xlu1 %305  ;;  %v932_v39 = vpop.xlane.xlu0 %931 }
 0x16c   :  { %1560 = vpow2.f32 %v358_v19  ;;  %v348_v36 = vsub.f32 %v1726_v34, %v321_v22  ;;  %v349_v23 = vsub.f32 %v1728_v35, %v321_v22  ;;  %v975_v24 = vsub.f32 %v1720_v29, %v944_v26 }
 0x16d   :  { %1562 = vpow2.f32 %v360_v20  ;;  %v976_v40 = vsub.f32 %v1722_v30, %v944_v26  ;;  %v326_v41 = vrot.slane %v325_v28, 1  ;;  %v949_v44 = vrot.slane %v948_v31, 1 }
 0x16e   :  { %v362_v45 = vmul.f32 1.442695, %v348_v36  ;;  %v364_v49 = vmul.f32 1.442695, %v349_v23  ;;  %v987_v50 = vmul.f32 1.442695, %v975_v24 }
 0x16f   :  { %v989_v51 = vmul.f32 1.442695, %v976_v40  ;;  %v327_v52 = vmax.f32 %v325_v28, %v326_v41  ;;  %v950_v54 = vmax.f32 %v948_v31, %v949_v44  ;;  %v330_v55 = vrot.slane %v329_v32, 2  ;;  %v309_v0 = vpop.xlane.xlu1 %308  ;;  %v935_v1 = vpop.xlane.xlu0 %934 }
 0x170   :  { %1564 = vpow2.f32 %v362_v45  ;;  %v953_v34 = vrot.slane %v952_v33, 2  ;;  %v334_v57 = vrot.slane %v306_v37, 4  ;;  %v957_v35 = vrot.slane %v932_v39, 4 }
 0x171   :  { %1566 = vpow2.f32 %v364_v49  ;;  %v350_v29 = vsub.f32 %v1736_v42, %v327_v52  ;;  %v351_v58 = vsub.f32 %v1740_v46, %v327_v52  ;;  %v977_v30 = vsub.f32 %v1738_v43, %v950_v54 }
 0x172   :  { %1568 = vpow2.f32 %v987_v50  ;;  %v978_v59 = vsub.f32 %v1730_v38, %v950_v54  ;;  %v331_v60 = vmax.f32 %v329_v32, %v330_v55  ;;  %v954_v62 = vmax.f32 %v952_v33, %v953_v34 }
 0x173   :  { %1570 = vpow2.f32 %v989_v51  ;;  %v366_v4 = vmul.f32 1.442695, %v350_v29  ;;  %v368_v5 = vmul.f32 1.442695, %v351_v58  ;;  %v991_v6 = vmul.f32 1.442695, %v977_v30 }
 0x174   :  { %v993_v8 = vmul.f32 1.442695, %v978_v59  ;;  %v332_v9 = vrot.slane %v331_v60, 1  ;;  %v955_v10 = vrot.slane %v954_v62, 1  ;;  %v335_v11 = vmax.f32 %v306_v37, %v334_v57  ;;  %v938_v37 = vpop.xlane.xlu0 %937 }
 0x175   :  { %1572 = vpow2.f32 %v366_v4  ;;  %v958_v42 = vmax.f32 %v932_v39, %v957_v35  ;;  %v340_v46 = vrot.slane %v309_v0, 4  ;;  %v963_v16 = vrot.slane %v935_v1, 4 }
 0x176   :  { %1574 = vpow2.f32 %v368_v5  ;;  %v333_v43 = vmax.f32 %v331_v60, %v332_v9  ;;  %v956_v17 = vmax.f32 %v954_v62, %v955_v10  ;;  %v336_v38 = vrot.slane %v335_v11, 2 }
 0x177   :  { %1576 = vpow2.f32 %v991_v6  ;;  %v959_v19 = vrot.slane %v958_v42, 2  ;;  %v341_v20 = vmax.f32 %v309_v0, %v340_v46  ;;  %v964_v22 = vmax.f32 %v935_v1, %v963_v16 }
 0x178   :  { %1578 = vpow2.f32 %v993_v8  ;;  %v352_v26 = vsub.f32 %v1750_v53, %v333_v43  ;;  %v353_v28 = vsub.f32 %v1752_v56, %v333_v43  ;;  %v979_v31 = vsub.f32 %v1744_v48, %v956_v17 }
 0x179   :  { %v1809_v32 = vpop.eup %1560  ;;  %v980_v33 = vsub.f32 %v1742_v47, %v956_v17  ;;  %v337_v36 = vmax.f32 %v335_v11, %v336_v38  ;;  %v960_v23 = vmax.f32 %v958_v42, %v959_v19  ;;  %v342_v24 = vrot.slane %v341_v20, 2 }
 0x17a   :  { %v1812_v39 = vpop.eup %1562  ;;  %v370_v40 = vmul.f32 1.442695, %v352_v26  ;;  %v372_v41 = vmul.f32 1.442695, %v353_v28  ;;  %v995_v44 = vmul.f32 1.442695, %v979_v31 }
 0x17b   :  { %v997_v45 = vmul.f32 1.442695, %v980_v33  ;;  %v338_v49 = vrot.slane %v337_v36, 1  ;;  %v961_v53 = vrot.slane %v960_v23, 1  ;;  %v343_v50 = vmax.f32 %v341_v20, %v342_v24 }
 0x17c   :  { %1580 = vpow2.f32 %v370_v40  ;;  %v965_v56 = vrot.slane %v964_v22, 2  ;;  %v969_v48 = vrot.slane %v938_v37, 4  ;;  %v382_v51 = vadd.f32 %v1812_v39, %v1809_v32 }
 0x17d   :  { %v1816_v47 = vpop.eup %1564  ;;  %1582 = vpow2.f32 %v372_v41  ;;  %v339_v52 = vmax.f32 %v337_v36, %v338_v49  ;;  %v962_v54 = vmax.f32 %v960_v23, %v961_v53  ;;  %v344_v55 = vrot.slane %v343_v50, 1 }
 0x17e   :  { %v1818_v34 = vpop.eup %1566  ;;  %1584 = vpow2.f32 %v995_v44  ;;  %v966_v57 = vmax.f32 %v964_v22, %v965_v56  ;;  %v970_v35 = vmax.f32 %v938_v37, %v969_v48  ;;  %383 = vadd.xlane.f32.xlu1 %v382_v51 }
 0x17f   :  { %v1820_v29 = vpop.eup %1568  ;;  %1586 = vpow2.f32 %v997_v45  ;;  %v354_v58 = vsub.f32 %v1762_v2, %v339_v52  ;;  %v355_v30 = vsub.f32 %v1764_v3, %v339_v52  ;;  %v981_v59 = vsub.f32 %v1760_v63, %v962_v54 }
 0x180   :  { %v1825_v60 = vpop.eup %1570  ;;  %v982_v62 = vsub.f32 %v1756_v61, %v962_v54  ;;  %v345_v0 = vmax.f32 %v343_v50, %v344_v55  ;;  %v967_v1 = vrot.slane %v966_v57, 1  ;;  %v971_v4 = vrot.slane %v970_v35, 2 }
 0x181   :  { %v374_v5 = vmul.f32 1.442695, %v354_v58  ;;  %v376_v6 = vmul.f32 1.442695, %v355_v30  ;;  %v999_v8 = vmul.f32 1.442695, %v981_v59  ;;  %v385_v9 = vadd.f32 %v1818_v34, %v1816_v47 }
 0x182   :  { %v1830_v10 = vpop.eup %1572  ;;  %v1001_v2 = vmul.f32 1.442695, %v982_v62  ;;  %v356_v3 = vsub.f32 %v1774_v13, %v345_v0  ;;  %v357_v63 = vsub.f32 %v1776_v14, %v345_v0  ;;  %v968_v11 = vmax.f32 %v966_v57, %v967_v1  ;;  %v1544_v59 = vld [vmem:[%s2292_s3 + $0x78] sm:$0xff]   ;;  %v1546_v0 = vld [vmem:[%s2292_s3 + $0x70] sm:$0xff]   ;;  %v1548_v1 = vld [vmem:[%s2292_s3 + $0x68] sm:$0xff]  }
 0x183   :  { %v1834_v42 = vpop.eup %1574  ;;  %1588 = vpow2.f32 %v374_v5  ;;  %v972_v61 = vmax.f32 %v970_v35, %v971_v4  ;;  %386 = vadd.xlane.f32.xlu0 %v385_v9  ;;  %v1011_v46 = vadd.f32 %v1825_v60, %v1820_v29  ;;  %v797_v30 = vcvt.s32.f32 %v1788_v21  ;;  %v1545_v62 = vld [vmem:[%s2292_s3 + $0x38] sm:$0xff]   ;;  %1481 = vmatprep.subr.bf16.mxu0 %v1544_v59  ;;  %v1547_v21 = vld [vmem:[%s2292_s3 + $0x30] sm:$0xff]   ;;  %v1549_v4 = vld [vmem:[%s2292_s3 + $0x28] sm:$0xff]  }
 0x184   :  { %v1838_v16 = vpop.eup %1576  ;;  %1590 = vpow2.f32 %v376_v6  ;;  %v378_v43 = vmul.f32 1.442695, %v356_v3  ;;  %v380_v17 = vmul.f32 1.442695, %v357_v63  ;;  %v983_v38 = vsub.f32 %v1772_v12, %v968_v11  ;;  %1503 = vmatprep.subr.bf16.mxu1 %v1544_v59  ;;  %1482 = vmatpush3.bf16.msra.mxu0 %v1545_v62  ;;  %v1550_v5 = vld [vmem:[%s2292_s3 + $0x60] sm:$0xff]   ;;  %v1553_v9 = vld [vmem:[%s2292_s3 + $0x18] sm:$0xff]  }
 0x185   :  { %v1841_v19 = vpop.eup %1578  ;;  %1592 = vpow2.f32 %v999_v8  ;;  %v984_v13 = vsub.f32 %v1766_v7, %v968_v11  ;;  %v973_v14 = vrot.slane %v972_v61, 1  ;;  %1012 = vadd.xlane.f32.xlu1 %v1011_v46  ;;  %v388_v20 = vadd.f32 %v1834_v42, %v1830_v10  ;;  %1504 = vmatpush3.bf16.msra.mxu1 %v1545_v62  ;;  %v1551_v6 = vld [vmem:[%s2292_s3 + $0x20] sm:$0xff]   ;;  %v1552_v8 = vld [vmem:[%s2292_s3 + $0x58] sm:$0xff]   ;;  %v1555_v3 = vld [vmem:[%s2292_s3 + $0x10] sm:$0xff]  }
 0x186   :  { %1594 = vpow2.f32 %v1001_v2  ;;  %v1003_v22 = vmul.f32 1.442695, %v983_v38  ;;  %v1014_v26 = vadd.f32 %v1841_v19, %v1838_v16  ;;  %1483 = vmatprep.subr.bf16.mxu0 %v1546_v0  ;;  %1505 = vmatprep.subr.bf16.mxu1 %v1546_v0  ;;  %v1554_v2 = vld [vmem:[%s2292_s3 + $0x50] sm:$0xff]   ;;  %v1556_v63 = vld [vmem:[%s2292_s3 + $0x48] sm:$0xff]   ;;  %v1559_v46 = vld [vmem:[%s2292_s3] sm:$0xff]  }
 0x187   :  { %1596 = vpow2.f32 %v378_v43  ;;  %v1005_v28 = vmul.f32 1.442695, %v984_v13  ;;  %v974_v31 = vmax.f32 %v972_v61, %v973_v14  ;;  %v1557_v11 = vld [vmem:[%s2292_s3 + $0x8] sm:$0xff]   ;;  %v1558_v61 = vld [vmem:[%s2292_s3 + $0x40] sm:$0xff]   ;;  %s1633_s3 = smov 8  }
 0x188   :  { %1598 = vpow2.f32 %v380_v17  ;;  %1015 = vadd.xlane.f32.xlu0 %v1014_v26  ;;  %1484 = vmatpush3.bf16.msra.mxu0 %v1547_v21 }
 0x189   :  { %v1848_v12 = vpop.eup %1580  ;;  %1600 = vpow2.f32 %v1003_v22  ;;  %v985_v7 = vsub.f32 %v1784_v18, %v974_v31  ;;  %v986_v33 = vsub.f32 %v1778_v15, %v974_v31  ;;  %389 = vadd.xlane.f32.xlu1 %v388_v20  ;;  %1506 = vmatpush3.bf16.msra.mxu1 %v1547_v21 }
 0x18a   :  { %v1852_v36 = vpop.eup %1582  ;;  %1602 = vpow2.f32 %v1005_v28  ;;  %1485 = vmatprep.subr.bf16.mxu0 %v1548_v1  ;;  %1507 = vmatprep.subr.bf16.mxu1 %v1548_v1 }
 0x18b   :  { %v1854_v23 = vpop.eup %1584  ;;  %v1007_v24 = vmul.f32 1.442695, %v985_v7  ;;  %v1009_v37 = vmul.f32 1.442695, %v986_v33  ;;  %v391_v40 = vadd.f32 %v1852_v36, %v1848_v12 }
 0x18c   :  { %v1858_v41 = vpop.eup %1586  ;;  %1486 = vmatpush3.bf16.msra.mxu0 %v1549_v4 }
 0x18d   :  { %1604 = vpow2.f32 %v1007_v24  ;;  %392 = vadd.xlane.f32.xlu1 %v391_v40  ;;  %v1017_v18 = vadd.f32 %v1858_v41, %v1854_v23  ;;  %1508 = vmatpush3.bf16.msra.mxu1 %v1549_v4 }
 0x18e   :  { %1606 = vpow2.f32 %v1009_v37  ;;  %1487 = vmatprep.subr.bf16.mxu0 %v1550_v5  ;;  %1509 = vmatprep.subr.bf16.mxu1 %v1550_v5 }
 0x18f   :  { %1018 = vadd.xlane.f32.xlu0 %v1017_v18 }
 0x190   :  { %v1862_v15 = vpop.eup %1588  ;;  %1488 = vmatpush3.bf16.msra.mxu0 %v1551_v6 }
 0x191   :  { %v1864_v44 = vpop.eup %1590  ;;  %1510 = vmatpush3.bf16.msra.mxu1 %v1551_v6  ;;  %1489 = vmatprep.subr.bf16.mxu0 %v1552_v8 }
 0x192   :  { %v1866_v45 = vpop.eup %1592  ;;  %v394_v49 = vadd.f32 %v1864_v44, %v1862_v15  ;;  %1511 = vmatprep.subr.bf16.mxu1 %v1552_v8 }
 0x193   :  { %v1870_v53 = vpop.eup %1594 }
 0x194   :  { %v1872_v50 = vpop.eup %1596  ;;  %395 = vadd.xlane.f32.xlu1 %v394_v49  ;;  %v1020_v56 = vadd.f32 %v1870_v53, %v1866_v45  ;;  %1490 = vmatpush3.bf16.msra.mxu0 %v1553_v9 }
 0x195   :  { %v1876_v48 = vpop.eup %1598  ;;  %1512 = vmatpush3.bf16.msra.mxu1 %v1553_v9  ;;  %1491 = vmatprep.subr.bf16.mxu0 %v1554_v2 }
 0x196   :  { %v1878_v51 = vpop.eup %1600  ;;  %1021 = vadd.xlane.f32.xlu0 %v1020_v56  ;;  %v397_v52 = vadd.f32 %v1876_v48, %v1872_v50  ;;  %1513 = vmatprep.subr.bf16.mxu1 %v1554_v2 }
 0x197   :  { %v1882_v54 = vpop.eup %1602 }
 0x198   :  { %398 = vadd.xlane.f32.xlu1 %v397_v52  ;;  %v1023_v55 = vadd.f32 %v1882_v54, %v1878_v51  ;;  %1492 = vmatpush3.bf16.msra.mxu0 %v1555_v3 }
 0x199   :  { %1514 = vmatpush3.bf16.msra.mxu1 %v1555_v3  ;;  %1493 = vmatprep.subr.bf16.mxu0 %v1556_v63 }
 0x19a   :  { %v1886_v57 = vpop.eup %1604  ;;  %1024 = vadd.xlane.f32.xlu0 %v1023_v55  ;;  %1515 = vmatprep.subr.bf16.mxu1 %v1556_v63 }
 0x19b   :  { %v1888_v35 = vpop.eup %1606 }
 0x19c   :  { %v1026_v58 = vadd.f32 %v1888_v35, %v1886_v57  ;;  %1494 = vmatpush3.bf16.msra.mxu0 %v1557_v11 }
 0x19d   :  { %1516 = vmatpush3.bf16.msra.mxu1 %v1557_v11  ;;  %1495 = vmatprep.subr.bf16.mxu0 %v1558_v61 }
 0x19e   :  { %1027 = vadd.xlane.f32.xlu0 %v1026_v58  ;;  %1517 = vmatprep.subr.bf16.mxu1 %v1558_v61 }
 0x1a0   :  { %1496 = vmatpush3.bf16.msra.mxu0 %v1559_v46 }
 0x1a1   :  { %1518 = vmatpush3.bf16.msra.mxu1 %v1559_v46 }
 0x1a9   :  { %800 = vbcast.lane.b32.xlu1 %v797_v30, 256 }
 0x207   :  { %v384_v43 = vpop.xlane.xlu1 %383 }
 0x208   :  { %v400_v17 = vrot.slane %v384_v43, 4 }
 0x20a   :  { %v401_v38 = vadd.f32 %v400_v17, %v384_v43 }
 0x20c   :  { %v402_v13 = vrot.slane %v401_v38, 2  ;;  %v387_v14 = vpop.xlane.xlu0 %386 }
 0x20d   :  { %v406_v20 = vrot.slane %v387_v14, 4 }
 0x20e   :  { %v403_v22 = vadd.f32 %v402_v13, %v401_v38  ;;  %v1013_v26 = vpop.xlane.xlu1 %1012 }
 0x20f   :  { %v1029_v28 = vrot.slane %v1013_v26, 4  ;;  %v407_v31 = vadd.f32 %v406_v20, %v387_v14 }
 0x210   :  { %v404_v7 = vrot.slane %v403_v22, 1 }
 0x211   :  { %v1030_v33 = vadd.f32 %v1029_v28, %v1013_v26  ;;  %v408_v24 = vrot.slane %v407_v31, 2  ;;  %v1016_v37 = vpop.xlane.xlu0 %1015 }
 0x212   :  { %v405_v40 = vadd.f32 %v404_v7, %v403_v22  ;;  %v390_v18 = vpop.xlane.xlu1 %389  ;;  %v1035_v49 = vrot.slane %v1016_v37, 4 }
 0x213   :  { %v1031_v56 = vrot.slane %v1030_v33, 2  ;;  %v409_v52 = vadd.f32 %v408_v24, %v407_v31  ;;  %v412_v55 = vrot.slane %v390_v18, 4 }
 0x214   :  { %1608 = vrcp.f32 %v405_v40  ;;  %v1036_v58 = vadd.f32 %v1035_v49, %v1016_v37 }
 0x215   :  { %v1032_v30 = vadd.f32 %v1031_v56, %v1030_v33  ;;  %v413_v59 = vadd.f32 %v412_v55, %v390_v18  ;;  %v410_v62 = vrot.slane %v409_v52, 1 }
 0x216   :  { %v1037_v0 = vrot.slane %v1036_v58, 2  ;;  %v393_v21 = vpop.xlane.xlu1 %392 }
 0x217   :  { %v1033_v1 = vrot.slane %v1032_v30, 1  ;;  %v414_v4 = vrot.slane %v413_v59, 2  ;;  %v418_v5 = vrot.slane %v393_v21, 4  ;;  %v411_v63 = vadd.f32 %v410_v62, %v409_v52 }
 0x218   :  { %v1038_v6 = vadd.f32 %v1037_v0, %v1036_v58  ;;  %v1019_v8 = vpop.xlane.xlu0 %1018 }
 0x219   :  { %v1034_v9 = vadd.f32 %v1033_v1, %v1032_v30  ;;  %v415_v2 = vadd.f32 %v414_v4, %v413_v59  ;;  %v419_v3 = vadd.f32 %v418_v5, %v393_v21  ;;  %v1041_v11 = vrot.slane %v1019_v8, 4 }
 0x21a   :  { %v1039_v46 = vrot.slane %v1038_v6, 1 }
 0x21b   :  { %1610 = vrcp.f32 %v1034_v9  ;;  %v416_v61 = vrot.slane %v415_v2, 1  ;;  %v420_v43 = vrot.slane %v419_v3, 2  ;;  %v1042_v17 = vadd.f32 %v1041_v11, %v1019_v8 }
 0x21c   :  { %1612 = vrcp.f32 %v411_v63  ;;  %v1040_v26 = vadd.f32 %v1039_v46, %v1038_v6 }
 0x21d   :  { %v417_v38 = vadd.f32 %v416_v61, %v415_v2  ;;  %v421_v13 = vadd.f32 %v420_v43, %v419_v3  ;;  %v396_v14 = vpop.xlane.xlu1 %395  ;;  %v1043_v20 = vrot.slane %v1042_v17, 2 }
 0x21e   :  { %v424_v22 = vrot.slane %v396_v14, 4 }
 0x21f   :  { %v422_v28 = vrot.slane %v421_v13, 1  ;;  %v1022_v31 = vpop.xlane.xlu0 %1021  ;;  %1614 = vrcp.f32 %v417_v38  ;;  %v1044_v7 = vadd.f32 %v1043_v20, %v1042_v17 }
 0x220   :  { %v425_v33 = vadd.f32 %v424_v22, %v396_v14  ;;  %v1047_v24 = vrot.slane %v1022_v31, 4  ;;  %1616 = vrcp.f32 %v1040_v26 }
 0x221   :  { %v1609_v37 = vpop.eup %1608  ;;  %v423_v40 = vadd.f32 %v422_v28, %v421_v13  ;;  %v399_v18 = vpop.xlane.xlu1 %398  ;;  %v1045_v49 = vrot.slane %v1044_v7, 1 }
 0x222   :  { %v426_v56 = vrot.slane %v425_v33, 2  ;;  %v1048_v52 = vadd.f32 %v1047_v24, %v1022_v31  ;;  %v430_v55 = vrot.slane %v399_v18, 4  ;;  %v442_v30 = vmul.f32 %v1609_v37, %v1809_v32 }
 0x223   :  { %v1025_v58 = vpop.xlane.xlu0 %1024  ;;  %v443_v59 = vmul.f32 %v1609_v37, %v1812_v39  ;;  %1618 = vrcp.f32 %v423_v40  ;;  %v1046_v8 = vadd.f32 %v1045_v49, %v1044_v7 }
 0x224   :  { %v427_v62 = vadd.f32 %v426_v56, %v425_v33  ;;  %v1049_v0 = vrot.slane %v1048_v52, 2  ;;  %v431_v21 = vadd.f32 %v430_v55, %v399_v18  ;;  %v1053_v1 = vrot.slane %v1025_v58, 4 }
 0x225   :  { %v519_v4 = vadd.f32 %v443_v59, %v442_v30  ;;  %v537_v5 = vrot.slane %v442_v30, 4  ;;  %v543_v6 = vrot.slane %v443_v59, 4  ;;  %v454_v32 = vmax.f32 %v442_v30, %v443_v59 }
 0x226   :  { %v428_v9 = vrot.slane %v427_v62, 1  ;;  %v1050_v2 = vadd.f32 %v1049_v0, %v1048_v52  ;;  %v432_v3 = vrot.slane %v431_v21, 2  ;;  %v1054_v63 = vadd.f32 %v1053_v1, %v1025_v58 }
 0x227   :  { %v1028_v11 = vpop.xlane.xlu0 %1027  ;;  %v538_v61 = vadd.f32 %v537_v5, %v442_v30  ;;  %v544_v46 = vadd.f32 %v543_v6, %v443_v59  ;;  %520 = vadd.xlane.f32.xlu1 %v519_v4  ;;  %455 = vmax.xlane.f32.xlu0 %v454_v32  ;;  %1620 = vrcp.f32 %v1046_v8 }
 0x228   :  { %v1611_v43 = vpop.eup %1610  ;;  %v429_v39 = vadd.f32 %v428_v9, %v427_v62  ;;  %v1051_v17 = vrot.slane %v1050_v2, 1  ;;  %v433_v38 = vadd.f32 %v432_v3, %v431_v21  ;;  %v1059_v13 = vrot.slane %v1028_v11, 4 }
 0x229   :  { %v1055_v14 = vrot.slane %v1054_v63, 2  ;;  %v539_v20 = vrot.slane %v538_v61, 2  ;;  %v1944_v22 = vmul.f32 %v1611_v43, %v1820_v29  ;;  %v1613_v7 = vpop.eup %1612  ;;  %v545_v37 = vrot.slane %v544_v46, 2 }
 0x22a   :  { %v1052_v26 = vadd.f32 %v1051_v17, %v1050_v2  ;;  %v434_v28 = vrot.slane %v433_v38, 1  ;;  %v1060_v31 = vadd.f32 %v1059_v13, %v1028_v11  ;;  %v1947_v40 = vmul.f32 %v1611_v43, %v1825_v60 }
 0x22b   :  { %v1056_v33 = vadd.f32 %v1055_v14, %v1054_v63  ;;  %v540_v24 = vadd.f32 %v539_v20, %v538_v61  ;;  %1622 = vrcp.f32 %v429_v39  ;;  %v1158_v56 = vrot.slane %v1944_v22, 4 }
 0x22c   :  { %v435_v18 = vadd.f32 %v434_v28, %v433_v38  ;;  %v1061_v49 = vrot.slane %v1060_v31, 2  ;;  %v1615_v52 = vpop.eup %1614  ;;  %v1140_v58 = vadd.f32 %v1947_v40, %v1944_v22  ;;  %v1164_v30 = vrot.slane %v1947_v40, 4 }
 0x22d   :  { %v1057_v55 = vrot.slane %v1056_v33, 1  ;;  %v541_v29 = vrot.slane %v540_v24, 1  ;;  %1624 = vrcp.f32 %v1052_v26  ;;  %v1159_v62 = vadd.f32 %v1158_v56, %v1944_v22  ;;  %v1617_v5 = vpop.eup %1616 }
 0x22e   :  { %v1062_v59 = vadd.f32 %v1061_v49, %v1060_v31  ;;  %v1955_v60 = vmul.f32 %v1613_v7, %v1816_v47  ;;  %v1165_v1 = vadd.f32 %v1164_v30, %v1947_v40  ;;  %1141 = vadd.xlane.f32.xlu1 %v1140_v58  ;;  %v1959_v4 = vmul.f32 %v1613_v7, %v1818_v34 }
 0x22f   :  { %v1058_v0 = vadd.f32 %v1057_v55, %v1056_v33  ;;  %v542_v21 = vadd.f32 %v541_v29, %v540_v24  ;;  %v1160_v8 = vrot.slane %v1159_v62, 2  ;;  %v1963_v2 = vmul.f32 %v1615_v52, %v1830_v10 }
 0x230   :  { %v1063_v6 = vrot.slane %v1062_v59, 1  ;;  %v549_v9 = vrot.slane %v1955_v60, 4  ;;  %v1619_v3 = vpop.eup %1618  ;;  %1626 = vrcp.f32 %v435_v18  ;;  %v522_v47 = vadd.f32 %v1959_v4, %v1955_v60 }
 0x231   :  { %v609_v63 = vpack.c.bf16 %v542_v21, %v542_v21  ;;  %v1161_v11 = vadd.f32 %v1160_v8, %v1159_v62  ;;  %v555_v34 = vrot.slane %v1959_v4, 4  ;;  %1628 = vrcp.f32 %v1058_v0 }
 0x232   :  { %v550_v61 = vadd.f32 %v549_v9, %v1955_v60  ;;  %v1969_v32 = vadd.f32 %v545_v37, %v544_v46  ;;  %523 = vadd.xlane.f32.xlu0 %v522_v47  ;;  %v1972_v43 = vmul.f32 %v1615_v52, %v1834_v42  ;;  %v561_v10 = vrot.slane %v1963_v2, 4 }
 0x233   :  { %v1064_v39 = vadd.f32 %v1063_v6, %v1062_v59  ;;  %v1162_v17 = vrot.slane %v1161_v11, 1  ;;  %v1166_v38 = vrot.slane %v1165_v1, 2  ;;  %v556_v14 = vadd.f32 %v555_v34, %v1959_v4 }
 0x234   :  { %v551_v13 = vrot.slane %v550_v61, 2  ;;  %v525_v20 = vadd.f32 %v1972_v43, %v1963_v2  ;;  %v562_v26 = vadd.f32 %v561_v10, %v1963_v2  ;;  %v1980_v46 = vmul.f32 %v1617_v5, %v1838_v16  ;;  %v1621_v33 = vpop.eup %1620 }
 0x235   :  { %v1982_v28 = vunpack.c.l.b16 %v609_v63  ;;  %v567_v31 = vrot.slane %v1972_v43, 4  ;;  %v1986_v7 = vmul.f32 %v1617_v5, %v1841_v19  ;;  %v1163_v24 = vadd.f32 %v1162_v17, %v1161_v11 }
 0x236   :  { %v552_v42 = vadd.f32 %v551_v13, %v550_v61  ;;  %v563_v37 = vrot.slane %v562_v26, 2  ;;  %526 = vadd.xlane.f32.xlu1 %v525_v20  ;;  %v1170_v18 = vrot.slane %v1980_v46, 4  ;;  %v1990_v49 = vmul.f32 %v1619_v3, %v1848_v12 }
 0x237   :  { %1630 = vrcp.f32 %v1064_v39  ;;  %v1992_v16 = vadd.f32 %v1166_v38, %v1165_v1  ;;  %v1143_v52 = vadd.f32 %v1986_v7, %v1980_v46  ;;  %v557_v29 = vrot.slane %v556_v14, 2 }
 0x238   :  { %v553_v56 = vrot.slane %v552_v42, 1  ;;  %v1623_v55 = vpop.eup %1622  ;;  %v564_v19 = vadd.f32 %v563_v37, %v562_v26  ;;  %v1171_v58 = vadd.f32 %v1170_v18, %v1980_v46  ;;  %v1176_v30 = vrot.slane %v1986_v7, 4 }
 0x239   :  { %v1999_v62 = vadd.f32 %v567_v31, %v1972_v43  ;;  %1144 = vadd.xlane.f32.xlu0 %v1143_v52  ;;  %v2002_v12 = vmul.f32 %v1619_v3, %v1852_v36  ;;  %v573_v0 = vrot.slane %v1990_v49, 4  ;;  %v1230_v1 = vpack.c.bf16 %v1163_v24, %v1163_v24 }
 0x23a   :  { %v554_v59 = vadd.f32 %v553_v56, %v552_v42  ;;  %v1625_v21 = vpop.eup %1624  ;;  %v565_v5 = vrot.slane %v564_v19, 1  ;;  %v1172_v6 = vrot.slane %v1171_v58, 2  ;;  %v1177_v8 = vadd.f32 %v1176_v30, %v1986_v7 }
 0x23b   :  { %v528_v47 = vadd.f32 %v2002_v12, %v1990_v49  ;;  %v574_v63 = vadd.f32 %v573_v0, %v1990_v49  ;;  %v457_v11 = vmax.f32 %v1955_v60, %v1959_v4  ;;  %v2011_v61 = vadd.f32 %v557_v29, %v556_v14 }
 0x23c   :  { %v611_v9 = vpack.c.bf16 %v554_v59, %v554_v59  ;;  %v566_v36 = vadd.f32 %v565_v5, %v564_v19  ;;  %v1173_v3 = vadd.f32 %v1172_v6, %v1171_v58  ;;  %v2014_v34 = vmul.f32 %v1623_v55, %v1862_v15 }
 0x23d   :  { %v1627_v10 = vpop.eup %1626  ;;  %v569_v39 = vrot.slane %v1999_v62, 2  ;;  %v575_v17 = vrot.slane %v574_v63, 2  ;;  %v579_v38 = vrot.slane %v2002_v12, 4  ;;  %529 = vadd.xlane.f32.xlu1 %v528_v47  ;;  %458 = vmax.xlane.f32.xlu0 %v457_v11  ;;  %v2019_v13 = vmul.f32 %v1623_v55, %v1864_v44 }
 0x23e   :  { %v2021_v20 = vunpack.c.l.b16 %v1230_v1  ;;  %v1174_v60 = vrot.slane %v1173_v3, 1  ;;  %v1178_v4 = vrot.slane %v1177_v8, 2  ;;  %v585_v14 = vrot.slane %v2014_v34, 4  ;;  %v1629_v26 = vpop.eup %1628 }
 0x23f   :  { %v2024_v15 = vunpack.c.l.b16 %v611_v9  ;;  %v576_v42 = vadd.f32 %v575_v17, %v574_v63  ;;  %v531_v31 = vadd.f32 %v2019_v13, %v2014_v34  ;;  %v2029_v24 = vmul.f32 %v1621_v33, %v1854_v23 }
 0x240   :  { %v613_v37 = vpack.c.bf16 %v566_v36, %v566_v36  ;;  %v1175_v18 = vadd.f32 %v1174_v60, %v1173_v3  ;;  %v586_v44 = vadd.f32 %v585_v14, %v2014_v34  ;;  %v2033_v56 = vmul.f32 %v1621_v33, %v1858_v41 }
 0x241   :  { %v2036_v52 = vadd.f32 %v579_v38, %v2002_v12  ;;  %532 = vadd.xlane.f32.xlu1 %v531_v31  ;;  %v1182_v55 = vrot.slane %v2029_v24, 4  ;;  %v2040_v29 = vmul.f32 %v1627_v10, %v1872_v50  ;;  %v2043_v19 = vmul.f32 %v1627_v10, %v1876_v48 }
 0x242   :  { %v577_v23 = vrot.slane %v576_v42, 1  ;;  %v587_v58 = vrot.slane %v586_v44, 2  ;;  %v1146_v30 = vadd.f32 %v2033_v56, %v2029_v24  ;;  %v1188_v41 = vrot.slane %v2033_v56, 4 }
 0x243   :  { %v2048_v33 = vadd.f32 %v1178_v4, %v1177_v8  ;;  %v1183_v59 = vadd.f32 %v1182_v55, %v2029_v24  ;;  %v534_v0 = vadd.f32 %v2043_v19, %v2040_v29  ;;  %v597_v50 = vrot.slane %v2040_v29, 4 }
 0x244   :  { %v1631_v1 = vpop.eup %1630  ;;  %v2054_v5 = vunpack.c.l.b16 %v613_v37  ;;  %v1232_v48 = vpack.c.bf16 %v1175_v18, %v1175_v18  ;;  %v591_v6 = vrot.slane %v2019_v13, 4  ;;  %1147 = vadd.xlane.f32.xlu0 %v1146_v30  ;;  %v2058_v9 = vmul.f32 %v1625_v21, %v1866_v45 }
 0x245   :  { %v2060_v47 = vadd.f32 %v587_v58, %v586_v44  ;;  %v1184_v8 = vrot.slane %v1183_v59, 2  ;;  %v598_v63 = vadd.f32 %v597_v50, %v2040_v29  ;;  %535 = vadd.xlane.f32.xlu1 %v534_v0  ;;  %v2064_v11 = vmul.f32 %v1625_v21, %v1870_v53 }
 0x246   :  { %v2066_v36 = vadd.f32 %v577_v23, %v576_v42  ;;  %v2069_v3 = vadd.f32 %v1188_v41, %v2033_v56  ;;  %v1194_v10 = vrot.slane %v2058_v9, 4  ;;  %v2073_v17 = vmul.f32 %v1629_v26, %v1878_v51 }
 0x247   :  { %v1185_v45 = vadd.f32 %v1184_v8, %v1183_v59  ;;  %v599_v38 = vrot.slane %v598_v63, 2  ;;  %v1149_v60 = vadd.f32 %v2064_v11, %v2058_v9  ;;  %v460_v4 = vmax.f32 %v1963_v2, %v1972_v43 }
 0x248   :  { %v1195_v53 = vadd.f32 %v1194_v10, %v2058_v9  ;;  %v1200_v21 = vrot.slane %v2064_v11, 4  ;;  %v2082_v14 = vmul.f32 %v1629_v26, %v1882_v54  ;;  %v1206_v42 = vrot.slane %v2073_v17, 4 }
 0x249   :  { %v2085_v31 = vunpack.c.l.b16 %v1232_v48  ;;  %v589_v51 = vrot.slane %v2060_v47, 1  ;;  %v1186_v37 = vrot.slane %v1185_v45, 1  ;;  %1150 = vadd.xlane.f32.xlu0 %v1149_v60  ;;  %461 = vmax.xlane.f32.xlu1 %v460_v4  ;;  %v2089_v18 = vmul.f32 %v1631_v1, %v1886_v57 }
 0x24a   :  { %v1190_v2 = vrot.slane %v2069_v3, 2  ;;  %v1196_v43 = vrot.slane %v1195_v53, 2  ;;  %v1207_v44 = vadd.f32 %v1206_v42, %v2073_v17  ;;  %v466_v54 = vmax.f32 %v2014_v34, %v2019_v13 }
 0x24b   :  { %v600_v26 = vadd.f32 %v599_v38, %v598_v63  ;;  %v1152_v55 = vadd.f32 %v2082_v14, %v2073_v17  ;;  %v2098_v23 = vmul.f32 %v1631_v1, %v1888_v35  ;;  %v1218_v58 = vrot.slane %v2089_v18, 4 }
 0x24c   :  { %v2101_v30 = vadd.f32 %v1186_v37, %v1185_v45  ;;  %v1197_v57 = vadd.f32 %v1196_v43, %v1195_v53  ;;  %v2104_v41 = vadd.f32 %v1200_v21, %v2064_v11  ;;  %v1208_v59 = vrot.slane %v1207_v44, 2 }
 0x24d   :  { %v1212_v0 = vrot.slane %v2082_v14, 4  ;;  %1153 = vadd.xlane.f32.xlu0 %v1152_v55  ;;  %467 = vmax.xlane.f32.xlu1 %v466_v54  ;;  %v1219_v34 = vadd.f32 %v1218_v58, %v2089_v18  ;;  %v469_v50 = vmax.f32 %v2040_v29, %v2043_v19  ;;  %v547_v35 = vrot.slane %v1969_v32, 1 }
 0x24e   :  { %v1198_v1 = vrot.slane %v1197_v57, 1  ;;  %v1083_v48 = vmax.f32 %v1944_v22, %v1947_v40  ;;  %v559_v8 = vrot.slane %v2011_v61, 1  ;;  %v570_v63 = vadd.f32 %v569_v39, %v1999_v62 }
 0x24f   :  { %v1155_v10 = vadd.f32 %v2098_v23, %v2089_v18  ;;  %v1086_v45 = vmax.f32 %v1980_v46, %v1986_v7  ;;  %v548_v29 = vadd.f32 %v547_v35, %v1969_v32  ;;  %v581_v38 = vrot.slane %v2036_v52, 2 }
 0x250   :  { %v1234_v22 = vpack.c.bf16 %v2101_v30, %v2101_v30  ;;  %v2125_v40 = vadd.f32 %v1208_v59, %v1207_v44  ;;  %v560_v60 = vadd.f32 %v559_v8, %v2011_v61  ;;  %v571_v62 = vrot.slane %v570_v63, 1 }
 0x251   :  { %v1220_v39 = vrot.slane %v1219_v34, 2  ;;  %1156 = vadd.xlane.f32.xlu0 %v1155_v10  ;;  %470 = vmax.xlane.f32.xlu1 %v469_v50  ;;  %v582_v46 = vadd.f32 %v581_v38, %v2036_v52  ;;  %v592_v32 = vadd.f32 %v591_v6, %v2019_v13  ;;  %v603_v7 = vrot.slane %v2043_v19, 4 }
 0x252   :  { %v2133_v4 = vadd.f32 %v1198_v1, %v1197_v57  ;;  %v572_v53 = vadd.f32 %v571_v62, %v570_v63  ;;  %v610_v21 = vpack.c.bf16 %v548_v29, %v548_v29  ;;  %v590_v61 = vadd.f32 %v589_v51, %v2060_v47 }
 0x253   :  { %v583_v42 = vrot.slane %v582_v46, 1  ;;  %v593_v37 = vrot.slane %v592_v32, 2  ;;  %v604_v43 = vadd.f32 %v603_v7, %v2043_v19  ;;  %v601_v44 = vrot.slane %v600_v26, 1 }
 0x254   :  { %v1210_v52 = vrot.slane %v2125_v40, 1  ;;  %v612_v54 = vpack.c.bf16 %v560_v60, %v560_v60  ;;  %v614_v55 = vpack.c.bf16 %v572_v53, %v572_v53  ;;  %v615_v13 = vpack.c.bf16 %v2066_v36, %v2066_v36 }
 0x255   :  { %1084 = vmax.xlane.f32.xlu0 %v1083_v48  ;;  %v584_v6 = vadd.f32 %v583_v42, %v582_v46  ;;  %v594_v58 = vadd.f32 %v593_v37, %v592_v32  ;;  %v605_v57 = vrot.slane %v604_v43, 2  ;;  %v602_v59 = vadd.f32 %v601_v44, %v600_v26 }
 0x256   :  { %v2140_v50 = vadd.f32 %v1220_v39, %v1219_v34  ;;  %v634_v47 = vunpack.c.l.b16 %v610_v21  ;;  %v617_v51 = vpack.c.bf16 %v590_v61, %v590_v61  ;;  %v639_v35 = vunpack.c.l.b16 %v615_v13 }
 0x257   :  { %v595_v1 = vrot.slane %v594_v58, 1  ;;  %v606_v19 = vadd.f32 %v605_v57, %v604_v43  ;;  %v616_v8 = vpack.c.bf16 %v584_v6, %v584_v6  ;;  %v619_v63 = vpack.c.bf16 %v602_v59, %v602_v59 }
 0x258   :  { %v636_v10 = vunpack.c.l.b16 %v612_v54  ;;  %v638_v29 = vunpack.c.l.b16 %v614_v55  ;;  %v641_v38 = vunpack.c.l.b16 %v617_v51  ;;  %v645_v36 = vsel %vm504_vm1, %v2024_v15, %v1982_v28 }
 0x259   :  { %1087 = vmax.xlane.f32.xlu0 %v1086_v45  ;;  %v596_v48 = vadd.f32 %v595_v1, %v594_v58  ;;  %v607_v60 = vrot.slane %v606_v19, 1  ;;  %v643_v26 = vunpack.c.l.b16 %v619_v63  ;;  %v1089_v34 = vmax.f32 %v2029_v24, %v2033_v56 }
 0x25a   :  { %v646_v62 = vsel %vm506_vm2, %v2054_v5, %v645_v36  ;;  %v1168_v39 = vrot.slane %v1992_v16, 1  ;;  %v1180_v46 = vrot.slane %v2048_v33, 1  ;;  %v1191_v32 = vadd.f32 %v1190_v2, %v2069_v3 }
 0x25b   :  { %v608_v7 = vadd.f32 %v607_v60, %v606_v19  ;;  %v618_v28 = vpack.c.bf16 %v596_v48, %v596_v48  ;;  %v640_v15 = vunpack.c.l.b16 %v616_v8  ;;  %v647_v45 = vsel %vm508_vm3, %v639_v35, %v646_v62 }
 0x25c   :  { %v650_v53 = vsel %vm504_vm1, %v636_v10, %v634_v47  ;;  %v648_v24 = vsel %vm510_vm4, %v641_v38, %v647_v45  ;;  %v1169_v56 = vadd.f32 %v1168_v39, %v1992_v16  ;;  %v1192_v5 = vrot.slane %v1191_v32, 1 }
 0x25d   :  { %v620_v21 = vpack.c.bf16 %v608_v7, %v608_v7  ;;  %v642_v61 = vunpack.c.l.b16 %v618_v28  ;;  %v649_v42 = vsel %vm512_vm5, %v643_v26, %v648_v24  ;;  %1090 = vmax.xlane.f32.xlu0 %v1089_v34  ;;  %v1202_v37 = vrot.slane %v2104_v41, 2 }
 0x25e   :  { %v651_v3 = vsel %vm506_vm2, %v638_v29, %v650_v53  ;;  %v1181_v2 = vadd.f32 %v1180_v46, %v2048_v33  ;;  %v1213_v43 = vadd.f32 %v1212_v0, %v2082_v14  ;;  %v1224_v44 = vrot.slane %v2098_v23, 4 }
 0x25f   :  { %v644_v54 = vunpack.c.l.b16 %v620_v21  ;;  %v652_v16 = vsel %vm508_vm3, %v640_v15, %v651_v3  ;;  %v1193_v55 = vadd.f32 %v1192_v5, %v1191_v32  ;;  %v1203_v13 = vadd.f32 %v1202_v37, %v2104_v41 }
 0x260   :  { %v653_v6 = vsel %vm510_vm4, %v642_v61, %v652_v16  ;;  %v655_v58 = vpack.c.b16 %v649_v42, %v649_v42  ;;  %v1214_v57 = vrot.slane %v1213_v43, 2  ;;  %v1225_v59 = vadd.f32 %v1224_v44, %v2098_v23 }
 0x261   :  { %v654_v33 = vsel %vm512_vm5, %v644_v54, %v653_v6  ;;  %v1204_v47 = vrot.slane %v1203_v13, 1  ;;  %v1231_v51 = vpack.c.bf16 %v1169_v56, %v1169_v56  ;;  %v1211_v0 = vadd.f32 %v1210_v52, %v2125_v40 }
 0x262   :  { %v656_v35 = vpack.c.b16 %v654_v33, %v654_v33  ;;  %v1215_v1 = vadd.f32 %v1214_v57, %v1213_v43  ;;  %v1226_v19 = vrot.slane %v1225_v59, 2  ;;  %v1233_v8 = vpack.c.bf16 %v1181_v2, %v1181_v2 }
 0x263   :  { %v1205_v63 = vadd.f32 %v1204_v47, %v1203_v13  ;;  %v1235_v10 = vpack.c.bf16 %v1193_v55, %v1193_v55  ;;  %v1222_v41 = vrot.slane %v2140_v50, 1  ;;  %v1236_v29 = vpack.c.bf16 %v2133_v4, %v2133_v4 }
 0x264   :  { %v1258_v38 = vunpack.c.l.b16 %v1234_v22  ;;  %787 = vmatprep.mubr.bf16.mxu0 %v656_v35  ;;  %v1216_v36 = vrot.slane %v1215_v1, 1  ;;  %v1227_v48 = vadd.f32 %v1226_v19, %v1225_v59  ;;  %v1238_v60 = vpack.c.bf16 %v1211_v0, %v1211_v0 }
 0x265   :  { %788 = vmatmul.mubr.bf16.vlgmr.msra.gmra.mxu0 %v655_v58  ;;  %v1237_v40 = vpack.c.bf16 %v1205_v63, %v1205_v63  ;;  %v1255_v52 = vunpack.c.l.b16 %v1231_v51  ;;  %v1223_v26 = vadd.f32 %v1222_v41, %v2140_v50  ;;  %v1260_v34 = vunpack.c.l.b16 %v1236_v29 }
 0x266   :  { %v1217_v62 = vadd.f32 %v1216_v36, %v1215_v1  ;;  %v1228_v39 = vrot.slane %v1227_v48, 1  ;;  %v1257_v46 = vunpack.c.l.b16 %v1233_v8  ;;  %v1262_v32 = vunpack.c.l.b16 %v1238_v60 }
 0x267   :  { %v1259_v7 = vunpack.c.l.b16 %v1235_v10  ;;  %v1240_v4 = vpack.c.bf16 %v1223_v26, %v1223_v26  ;;  %v1266_v30 = vsel %vm504_vm1, %v2085_v31, %v2021_v20  ;;  %v463_v22 = vmax.f32 %v1990_v49, %v2002_v12 }
 0x268   :  { %v1229_v28 = vadd.f32 %v1228_v39, %v1227_v48  ;;  %v1239_v15 = vpack.c.bf16 %v1217_v62, %v1217_v62  ;;  %v1261_v45 = vunpack.c.l.b16 %v1237_v40  ;;  %v1267_v53 = vsel %vm506_vm2, %v1258_v38, %v1266_v30 }
 0x269   :  { %v1264_v50 = vunpack.c.l.b16 %v1240_v4  ;;  %v1268_v24 = vsel %vm508_vm3, %v1260_v34, %v1267_v53  ;;  %464 = vmax.xlane.f32.xlu0 %v463_v22  ;;  %v1271_v21 = vsel %vm504_vm1, %v1257_v46, %v1255_v52  ;;  %v1092_v49 = vmax.f32 %v2058_v9, %v2064_v11  ;;  %v801_v9 = vpop.permute.xlu1 %800 }
 0x26a   :  { %v1241_v56 = vpack.c.bf16 %v1229_v28, %v1229_v28  ;;  %v1263_v5 = vunpack.c.l.b16 %v1239_v15  ;;  %v1269_v61 = vsel %vm510_vm4, %v1262_v32, %v1268_v24  ;;  %v1272_v20 = vsel %vm506_vm2, %v1259_v7, %v1271_v21 }
 0x26b   :  { %v1270_v31 = vsel %vm512_vm5, %v1264_v50, %v1269_v61  ;;  %v1273_v42 = vsel %vm508_vm3, %v1261_v45, %v1272_v20  ;;  %v1095_v44 = vmax.f32 %v2073_v17, %v2082_v14  ;;  %v1098_v54 = vmax.f32 %v2089_v18, %v2098_v23 }
 0x26c   :  { %v1265_v12 = vunpack.c.l.b16 %v1241_v56  ;;  %v1274_v37 = vsel %vm510_vm4, %v1263_v5, %v1273_v42  ;;  %v1276_v2 = vpack.c.b16 %v1270_v31, %v1270_v31 }
 0x26d   :  { %1093 = vmax.xlane.f32.xlu0 %v1092_v49 }
 0x26e   :  { %v1275_v3 = vsel %vm512_vm5, %v1265_v12, %v1274_v37 }
 0x26f   :  { %v1277_v43 = vpack.c.b16 %v1275_v3, %v1275_v3 }
 0x271   :  { %1312 = vmatprep.mubr.bf16.mxu1 %v1277_v43  ;;  %1096 = vmax.xlane.f32.xlu0 %v1095_v44 }
 0x272   :  { %1313 = vmatmul.mubr.bf16.vlgmr.msra.gmra.mxu1 %v1276_v2 }
 0x275   :  { %1099 = vmax.xlane.f32.xlu0 %v1098_v54 }
 0x2b0   :  { %v521_v11 = vpop.xlane.xlu1 %520  ;;  %v2200_v13 = vpop.xlane.xlu0 %455 }
 0x2b1   :  { %v803_v16 = vmul.f32 %v801_v9, %v521_v11  ;;  %v878_v55 = vrot.slane %v521_v11, %v1794_v27 }
 0x2b3   :  { %816 = vperm.xlu0 %1527, %v803_v16  }
 0x2b7   :  { %v1142_v6 = vpop.xlane.xlu1 %1141 }
 0x2b8   :  { %v1322_v58 = vmul.f32 %v1142_v6, %v801_v9  ;;  %v1396_v57 = vrot.slane %v1142_v6, %v1794_v27 }
 0x2ba   :  { %1335 = vperm.xlu1 %1528, %v1322_v58  }
 0x2bb   :  { %v524_v17 = vpop.xlane.xlu0 %523 }
 0x2bc   :  { %v804_v14 = vmul.f32 %v801_v9, %v524_v17  ;;  %v882_v59 = vrot.slane %v524_v17, %v1794_v27 }
 0x2be   :  { %v899_v18 = vsel %vm504_vm1, %v882_v59, %v878_v55  ;;  %819 = vperm.xlu0 %1527, %v804_v14  }
 0x2bf   :  { %v527_v23 = vpop.xlane.xlu1 %526 }
 0x2c0   :  { %v805_v33 = vmul.f32 %v801_v9, %v527_v23  ;;  %v886_v47 = vrot.slane %v527_v23, %v1794_v27 }
 0x2c2   :  { %v900_v51 = vsel %vm506_vm2, %v886_v47, %v899_v18  ;;  %v1145_v0 = vpop.xlane.xlu0 %1144  ;;  %822 = vperm.xlu0 %1527, %v805_v33  }
 0x2c3   :  { %v1323_v35 = vmul.f32 %v1145_v0, %v801_v9  ;;  %v1400_v1 = vrot.slane %v1145_v0, %v1794_v27 }
 0x2c5   :  { %v1417_v19 = vsel %vm504_vm1, %v1400_v1, %v1396_v57  ;;  %1338 = vperm.xlu1 %1528, %v1323_v35  }
 0x2c6   :  { %v530_v8 = vpop.xlane.xlu1 %529  ;;  %v459_v41 = vpop.xlane.xlu0 %458 }
 0x2c7   :  { %v806_v63 = vmul.f32 %v801_v9, %v530_v8  ;;  %v890_v10 = vrot.slane %v530_v8, %v1794_v27  ;;  %v487_v12 = vrot.slane %v459_v41, %v1791_v25 }
 0x2c9   :  { %v901_v29 = vsel %vm508_vm3, %v890_v10, %v900_v51  ;;  %825 = vperm.xlu0 %1527, %v806_v63  }
 0x2ca   :  { %v533_v38 = vpop.xlane.xlu1 %532 }
 0x2cb   :  { %v894_v36 = vrot.slane %v533_v38, %v1794_v27  ;;  %v807_v22 = vmul.f32 %v801_v9, %v533_v38 }
 0x2cd   :  { %v902_v48 = vsel %vm510_vm4, %v894_v36, %v901_v29  ;;  %v1148_v60 = vpop.xlane.xlu0 %1147 }
 0x2ce   :  { %v1324_v40 = vmul.f32 %v1148_v60, %v801_v9  ;;  %v1404_v52 = vrot.slane %v1148_v60, %v1794_v27  ;;  %v536_v26 = vpop.xlane.xlu1 %535 }
 0x2cf   :  { %v898_v34 = vrot.slane %v536_v26, %v1794_v27  ;;  %v808_v5 = vmul.f32 %v801_v9, %v536_v26 }
 0x2d0   :  { %v1418_v62 = vsel %vm506_vm2, %v1404_v52, %v1417_v19  ;;  %1341 = vperm.xlu1 %1528, %v1324_v40  }
 0x2d1   :  { %v903_v39 = vsel %vm512_vm5, %v898_v34, %v902_v48 }
 0x2d2   :  { %v1151_v46 = vpop.xlane.xlu0 %1150  ;;  %v462_v31 = vpop.xlane.xlu1 %461 }
 0x2d3   :  { %v1325_v32 = vmul.f32 %v1151_v46, %v801_v9  ;;  %v1408_v7 = vrot.slane %v1151_v46, %v1794_v27  ;;  %v491_v42 = vrot.slane %v462_v31, %v1791_v25 }
 0x2d5   :  { %v1419_v4 = vsel %vm508_vm3, %v1408_v7, %v1418_v62  ;;  %1344 = vperm.xlu1 %1528, %v1325_v32  }
 0x2d6   :  { %v1154_v30 = vpop.xlane.xlu0 %1153  ;;  %v468_v37 = vpop.xlane.xlu1 %467 }
 0x2d7   :  { %v1412_v28 = vrot.slane %v1154_v30, %v1794_v27  ;;  %v1326_v53 = vmul.f32 %v1154_v30, %v801_v9  ;;  %v499_v11 = vrot.slane %v468_v37, %v1791_v25 }
 0x2d9   :  { %v1420_v15 = vsel %vm510_vm4, %v1412_v28, %v1419_v4  ;;  %828 = vperm.xlu1 %1528, %v807_v22  }
 0x2da   :  { %v1157_v45 = vpop.xlane.xlu0 %1156  ;;  %v471_v16 = vpop.xlane.xlu1 %470 }
 0x2db   :  { %v1327_v50 = vmul.f32 %v1157_v45, %v801_v9  ;;  %v1416_v24 = vrot.slane %v1157_v45, %v1794_v27  ;;  %v483_v27 = vrot.slane %v2200_v13, %v1791_v25  ;;  %v503_v13 = vrot.slane %v471_v16, %v1791_v25 }
 0x2dd   :  { %1347 = vperm.xlu1 %1528, %v1326_v53   ;;  %1350 = vperm.xlu0 %1527, %v1327_v50   ;;  %v1421_v56 = vsel %vm512_vm5, %v1416_v24, %v1420_v15  ;;  %v505_v43 = vsel %vm504_vm1, %v487_v12, %v483_v27 }
 0x2de   :  { %v1085_v21 = vpop.xlane.xlu0 %1084  ;;  %v507_v44 = vsel %vm506_vm2, %v491_v42, %v505_v43 }
 0x2df   :  { %v1110_v17 = vrot.slane %v1085_v21, %v1791_v25 }
 0x2e1   :  { %831 = vperm.xlu1 %1528, %v808_v5  }
 0x2e2   :  { %v1088_v61 = vpop.xlane.xlu0 %1087 }
 0x2e3   :  { %v1114_v55 = vrot.slane %v1088_v61, %v1791_v25 }
 0x2e5   :  { %v1131_v18 = vsel %vm504_vm1, %v1114_v55, %v1110_v17 }
 0x2e6   :  { %v1091_v20 = vpop.xlane.xlu0 %1090 }
 0x2e7   :  { %v1118_v6 = vrot.slane %v1091_v20, %v1791_v25 }
 0x2e9   :  { %v1132_v47 = vsel %vm506_vm2, %v1118_v6, %v1131_v18 }
 0x2f2   :  { %v465_v49 = vpop.xlane.xlu0 %464 }
 0x2f3   :  { %v495_v2 = vrot.slane %v465_v49, %v1791_v25 }
 0x2f5   :  { %v509_v9 = vsel %vm508_vm3, %v495_v2, %v507_v44 }
 0x2f6   :  { %v1094_v3 = vpop.xlane.xlu0 %1093  ;;  %v511_v57 = vsel %vm510_vm4, %v499_v11, %v509_v9 }
 0x2f7   :  { %v1122_v14 = vrot.slane %v1094_v3, %v1791_v25  ;;  %v513_v33 = vsel %vm512_vm5, %v503_v13, %v511_v57 }
 0x2f8   :  { %v516_v0 = vsel %vm515_vm6, %v513_v33, -inf }
 0x2f9   :  { %v1133_v51 = vsel %vm508_vm3, %v1122_v14, %v1132_v47 }
 0x2fa   :  { %v1097_v54 = vpop.xlane.xlu0 %1096 }
 0x2fb   :  { %v1126_v59 = vrot.slane %v1097_v54, %v1791_v25 }
 0x2fd   :  { %v1134_v35 = vsel %vm510_vm4, %v1126_v59, %v1133_v51 }
 0x2fe   :  { %v1100_v58 = vpop.xlane.xlu0 %1099 }
 0x2ff   :  { %v1130_v23 = vrot.slane %v1100_v58, %v1791_v25 }
 0x301   :  { %v1135_v1 = vsel %vm512_vm5, %v1130_v23, %v1134_v35 }
 0x302   :  { %v1137_v19 = vsel %vm515_vm6, %v1135_v1, -inf }
 0x305   :  { %517 = vmax.xlane.f32.xlu1 %v516_v0 }
 0x309   :  { %1138 = vmax.xlane.f32.xlu1 %v1137_v19 }
 0x325   :  { %v1497_v8 = vpop.f32.mrf.mxu0 }
 0x327   :  { %v1498_v63 = vpop.f32.mrf.mxu0 }
 0x328   :  { %v1499_v10 = vadd.f32 %v1498_v63, %v1497_v8 }
 0x329   :  { %v1500_v41 = vpop.f32.mrf.mxu0 }
 0x32a   :  { %v2249_v29 = vsel %vm124_vm0, %v1499_v10, %v903_v39  ;;  %v795_v58 = vmul.f32 0.0625, %v1499_v10 }
 0x32b   :  { %v1501_v38 = vpop.f32.mrf.mxu0 }
 0x32c   :  { %v1476_v13 = vadd.f32 -0.5, %v795_v58 }
 0x32e   :  { %v817_v62 = vpop.permute.xlu0 %816 }
 0x32f   :  { %v836_v24 = vrot.slane %v817_v62, %v1791_v25 }
 0x332   :  { %v1519_v36 = vpop.f32.mrf.mxu1 }
 0x334   :  { %v1520_v48 = vpop.f32.mrf.mxu1 }
 0x335   :  { %v1521_v60 = vadd.f32 %v1520_v48, %v1519_v36  ;;  %v1336_v34 = vpop.permute.xlu1 %1335 }
 0x336   :  { %v1522_v40 = vpop.f32.mrf.mxu1  ;;  %v1355_v45 = vrot.slane %v1336_v34, %v1791_v25 }
 0x337   :  { %v1427_v52 = vsel %vm124_vm0, %v1521_v60, %v1421_v56  ;;  %v1320_v57 = vmul.f32 0.0625, %v1521_v60 }
 0x338   :  { %v1523_v26 = vpop.f32.mrf.mxu1 }
 0x339   :  { %v820_v32 = vpop.permute.xlu0 %819  ;;  %v1478_v17 = vadd.f32 -0.5, %v1320_v57 }
 0x33a   :  { %v840_v50 = vrot.slane %v820_v32, %v1791_v25 }
 0x33c   :  { %v857_v3 = vsel %vm504_vm1, %v840_v50, %v836_v24 }
 0x33d   :  { %v823_v4 = vpop.permute.xlu0 %822 }
 0x33e   :  { %v844_v5 = vrot.slane %v823_v4, %v1791_v25 }
 0x340   :  { %v1339_v46 = vpop.permute.xlu1 %1338  ;;  %v858_v2 = vsel %vm506_vm2, %v844_v5, %v857_v3 }
 0x341   :  { %v1359_v22 = vrot.slane %v1339_v46, %v1791_v25 }
 0x343   :  { %v1376_v56 = vsel %vm504_vm1, %v1359_v22, %v1355_v45 }
 0x344   :  { %v826_v28 = vpop.permute.xlu0 %825 }
 0x345   :  { %v848_v20 = vrot.slane %v826_v28, %v1791_v25 }
 0x347   :  { %v859_v54 = vsel %vm508_vm3, %v848_v20, %v858_v2 }
 0x34b   :  { %v1342_v7 = vpop.permute.xlu1 %1341 }
 0x34c   :  { %v1363_v15 = vrot.slane %v1342_v7, %v1791_v25 }
 0x34e   :  { %v1377_v31 = vsel %vm506_vm2, %v1363_v15, %v1376_v56 }
 0x350   :  { %v1345_v30 = vpop.permute.xlu1 %1344 }
 0x351   :  { %v1367_v53 = vrot.slane %v1345_v30, %v1791_v25 }
 0x353   :  { %v1378_v42 = vsel %vm508_vm3, %v1367_v53, %v1377_v31 }
 0x354   :  { %v829_v39 = vpop.permute.xlu1 %828 }
 0x355   :  { %v852_v37 = vrot.slane %v829_v39, %v1791_v25 }
 0x357   :  { %v860_v16 = vsel %vm510_vm4, %v852_v37, %v859_v54 }
 0x358   :  { %v1348_v21 = vpop.permute.xlu1 %1347  ;;  %v1351_v61 = vpop.permute.xlu0 %1350 }
 0x359   :  { %v1371_v49 = vrot.slane %v1348_v21, %v1791_v25  ;;  %v1375_v12 = vrot.slane %v1351_v61, %v1791_v25 }
 0x35b   :  { %v1379_v27 = vsel %vm510_vm4, %v1371_v49, %v1378_v42 }
 0x35c   :  { %v832_v43 = vpop.permute.xlu1 %831  ;;  %v1380_v44 = vsel %vm512_vm5, %v1375_v12, %v1379_v27 }
 0x35d   :  { %v856_v9 = vrot.slane %v832_v43, %v1791_v25  ;;  %v1382_v11 = vsel %vm515_vm6, %v1380_v44, 0.0 }
 0x35e   :  { %1383 = vadd.xlane.f32.xlu0 %v1382_v11 }
 0x35f   :  { %v861_v55 = vsel %vm512_vm5, %v856_v9, %v860_v16 }
 0x360   :  { %v863_v6 = vsel %vm515_vm6, %v861_v55, 0.0 }
 0x361   :  { %864 = vadd.xlane.f32.xlu1 %v863_v6 }
 0x372   :  { %906 = vrot.lane.b32.xlu1 %v1476_v13, %s1633_s3 }
 0x374   :  { %1424 = vrot.lane.b32.xlu0 %v1478_v17, %s1633_s3 }
 0x38e   :  { %v518_v14 = vpop.xlane.xlu1 %517 }
 0x392   :  { %v1139_v59 = vpop.xlane.xlu1 %1138 }
 0x3e7   :  { %v1384_v25 = vpop.xlane.xlu0 %1383 }
 0x3e8   :  { %v1385_v18 = vmul.f32 0.125, %v1384_v25 }
 0x3ea   :  { %v865_v23 = vpop.xlane.xlu1 %864  ;;  %v1479_v51 = vadd.f32 -0.5, %v1385_v18 }
 0x3eb   :  { %v866_v33 = vmul.f32 0.125, %v865_v23  ;;  %v1425_v47 = vpop.permute.xlu0 %1424 }
 0x3ec   :  { %v1428_v0 = vsel %vm910_vm7, %v1427_v52, %v1425_v47 }
 0x3ed   :  { %v1429_v35 = vsel %vm912_vm8, %v1428_v0, %v1425_v47  ;;  %v1477_v8 = vadd.f32 -0.5, %v866_v33 }
 0x3ee   :  { %v1430_v1 = vsel %vm914_vm9, %v1429_v35, %v1479_v51  ;;  %v907_v19 = vpop.permute.xlu1 %906 }
 0x3ef   :  { %v1431_v63 = vsel %vm916_vm10, %v1430_v1, %v1139_v59  ;;  %v911_v10 = vsel %vm910_vm7, %v2249_v29, %v907_v19 }
 0x3f0   :  { %v1432_v41 = vsel %vm918_vm11, %v1431_v63, 0.0  ;;  %v913_v38 = vsel %vm912_vm8, %v911_v10, %v907_v19 }
 0x3f1   :  { %1480 = vst [vmem:[%s2293_s4 + $0x8] sm:$0x3f] %v1432_v41  ;;  %v915_v36 = vsel %vm914_vm9, %v913_v38, %v1477_v8 }
 0x3f2   :  { %v917_v48 = vsel %vm916_vm10, %v915_v36, %v518_v14 }
 0x3f3   :  { %v919_v60 = vsel %vm918_vm11, %v917_v48, 0.0 }
 0x3f4   :  { %920 = vst [vmem:[%s2293_s4] sm:$0x3f] %v919_v60 }

</bundles_post_ra>
